<compile_context>
chip_gen: v7x
topology: tpu7x:2x2x1
jax: 0.10.0
libtpu: 0.0.40
codegen_flags: <defaults>
</compile_context>

<pallas_src>
import jax
import jax.numpy as jnp
from jax.experimental import pallas as pl
from jax.experimental.pallas import tpu as pltpu

D_MODEL = 32
N_HEADS = 4
D_HEAD = D_MODEL // N_HEADS
D_FF = 64
EPS = 1e-6
NEG_INF = -1e9

# Set to jnp.bfloat16 on v6e/v7x at non-toy shapes (~2-3x MXU throughput, f32 accum).
MXU_DTYPE = jnp.float32


# ----------------------------------------------------------------------------
# Small matmul helpers (f32 accumulation via preferred_element_type).
# ----------------------------------------------------------------------------
def _mm(a, b):
    return jnp.dot(a.astype(MXU_DTYPE), b.astype(MXU_DTYPE),
                   preferred_element_type=jnp.float32)


def _mm_t(a, b):
    # a @ b.T without materializing a transpose: contract last dim of both operands.
    return jax.lax.dot_general(
        a.astype(MXU_DTYPE), b.astype(MXU_DTYPE),
        dimension_numbers=(((1,), (1,)), ((), ())),
        preferred_element_type=jnp.float32)


# ----------------------------------------------------------------------------
# In-kernel math
# ----------------------------------------------------------------------------
def _layer_norm_k(x, alpha, bias):
    # Matches the reference LayerNormalization: unbiased (N-1) variance, eps added to
    # std.  Exact reciprocal here (its error would otherwise propagate through all
    # three residual branches); cost is one divide per row.
    mean = jnp.mean(x, axis=-1, keepdims=True)
    d = x - mean
    var = jnp.sum(d * d, axis=-1, keepdims=True) * (1.0 / (x.shape[-1] - 1))
    inv = pl.reciprocal(jnp.sqrt(var) + EPS, approx=False)
    return alpha * d * inv + bias


def _mha_k(x_q, x_kv, wq_t, wk_t, wv_t, wo_t, mask):
    # x_q: (Sq, D), x_kv: (Sk, D), mask: (Sq, Sk) or (1, Sk) (broadcast over rows).
    scale = 1.0 / (D_HEAD ** 0.5)
    q = _mm(x_q, wq_t) * scale          # scale folded into q once
    k = _mm(x_kv, wk_t)
    v = _mm(x_kv, wv_t)
    is_masked = (mask == 0.0)           # one compare, hoisted out of the head loop

    out = None
    for h in range(N_HEADS):            # static loop, static lane/sublane slices
        lo = h * D_HEAD
        qs = q[:, lo:lo + D_HEAD]
        ks = k[:, lo:lo + D_HEAD]
        vs = v[:, lo:lo + D_HEAD]
        s = _mm_t(qs, ks)                               # (Sq, Sk), no XLU transpose
        s = jnp.where(is_masked, NEG_INF, s)            # overwrite, as in reference
        m = jnp.max(s, axis=-1, keepdims=True)
        p = jnp.exp(s - m)
        inv = pl.reciprocal(jnp.sum(p, axis=-1, keepdims=True), approx=True)
        ctx = _mm(p, vs) * inv                          # normalize (Sq, D_HEAD) context
        # Per-head partial O-projection (sublane-aligned static row slice of Wo^T);
        # avoids concatenating 8-lane head pieces.
        part = _mm(ctx, wo_t[lo:lo + D_HEAD, :])
        out = part if out is None else out + part
    return out


def _ffn_k(x, w1_t, b1, w2_t, b2):
    h = jnp.maximum(_mm(x, w1_t) + b1, 0.0)
    return _mm(h, w2_t) + b2


# ----------------------------------------------------------------------------
# Pallas kernel: one grid step = one batch element, whole decoder block fused.
# ----------------------------------------------------------------------------
def decoder_block_kernel(
    x_ref, enc_ref, tgt_mask_ref, src_mask_ref,
    sa_wq, sa_wk, sa_wv, sa_wo,
    ca_wq, ca_wk, ca_wv, ca_wo,
    ff_w1, ff_b1, ff_w2, ff_b2,
    ln1_a, ln1_b, ln2_a, ln2_b, ln3_a, ln3_b,
    out_ref,
):
    x = x_ref[0]                    # (S_t, D)
    enc = enc_ref[0]                # (S_s, D)
    tgt_mask = tgt_mask_ref[0]      # (S_t, S_t)
    src_mask = src_mask_ref[0]      # (1, S_s)

    # Residual 1: self-attention (pre-norm).  Dropout = identity (eval).
    xn = _layer_norm_k(x, ln1_a[...], ln1_b[...])
    x = x + _mha_k(xn, xn, sa_wq[...], sa_wk[...], sa_wv[...], sa_wo[...], tgt_mask)

    # Residual 2: cross-attention against encoder output.
    xn = _layer_norm_k(x, ln2_a[...], ln2_b[...])
    x = x + _mha_k(xn, enc, ca_wq[...], ca_wk[...], ca_wv[...], ca_wo[...], src_mask)

    # Residual 3: feed-forward.
    xn = _layer_norm_k(x, ln3_a[...], ln3_b[...])
    x = x + _ffn_k(xn, ff_w1[...], ff_b1[...], ff_w2[...], ff_b2[...])

    # TODO(synk): at real D_MODEL keep the output last dim a multiple of 128 so this
    # store is lane-dense (vst, not vst.msk).
    out_ref[0] = x


# ----------------------------------------------------------------------------
# Host-side wrapper: free layout prep (weight transpose), batch grid.
# ----------------------------------------------------------------------------
def decoder_block(x, enc_out, src_mask, tgt_mask, params):
    B, S_t, D = x.shape
    S_s = enc_out.shape[1]
    (sa_wq, sa_wk, sa_wv, sa_wo, ca_wq, ca_wk, ca_wv, ca_wo,
     ff_w1, ff_b1, ff_w2, ff_b2,
     ln1_a, ln1_b, ln2_a, ln2_b, ln3_a, ln3_b) = params

    # Weights pre-transposed to (in, out) so the kernel never transposes.
    pre = (sa_wq.T, sa_wk.T, sa_wv.T, sa_wo.T,
           ca_wq.T, ca_wk.T, ca_wv.T, ca_wo.T,
           ff_w1.T, ff_b1, ff_w2.T, ff_b2,
           ln1_a, ln1_b, ln2_a, ln2_b, ln3_a, ln3_b)

    per_batch = lambda b: (b, 0, 0)
    resident = lambda b: (0, 0)      # constant block index -> fetched once

    in_specs = [
        pl.BlockSpec((1, S_t, D), per_batch),         # x
        pl.BlockSpec((1, S_s, D), per_batch),         # encoder output
        pl.BlockSpec((1, S_t, S_t), per_batch),       # tgt_mask (per batch, no B^2 bias)
        pl.BlockSpec((1, 1, S_s), per_batch),         # src_mask
    ] + [pl.BlockSpec(w.shape, resident) for w in pre]

    out = pl.pallas_call(
        decoder_block_kernel,
        out_shape=jax.ShapeDtypeStruct((B, S_t, D), jnp.float32),
        grid=(B,),
        in_specs=in_specs,
        out_specs=pl.BlockSpec((1, S_t, D), per_batch),
        compiler_params=pltpu.CompilerParams(
            dimension_semantics=("parallel",),        # megacore sharding on v7x
            vmem_limit_bytes=32 * 1024 * 1024,        # v5e scoped default is only 16 MiB
        ),
    )(x, enc_out,
      tgt_mask.astype(jnp.float32), src_mask.astype(jnp.float32),
      *pre)
    return out


# ----------------------------------------------------------------------------
# Pure-JAX reference (per-batch, exact divisions) mirroring the PyTorch module.
# ----------------------------------------------------------------------------
def decoder_block_ref(x, enc_out, src_mask, tgt_mask, params):
    (sa_wq, sa_wk, sa_wv, sa_wo, ca_wq, ca_wk, ca_wv, ca_wo,
     ff_w1, ff_b1, ff_w2, ff_b2,
     ln1_a, ln1_b, ln2_a, ln2_b, ln3_a, ln3_b) = params

    def layer_norm(t, a, b):
        mean = jnp.mean(t, axis=-1, keepdims=True)
        var = jnp.sum((t - mean) ** 2, axis=-1, keepdims=True) / (t.shape[-1] - 1)
        return a * (t - mean) / (jnp.sqrt(var) + EPS) + b

    def mha(xq, xkv, wq, wk, wv, wo, mask):
        q, k, v = xq @ wq.T, xkv @ wk.T, xkv @ wv.T
        outs = []
        for h in range(N_HEADS):
            lo = h * D_HEAD
            qs, ks, vs = q[:, lo:lo + D_HEAD], k[:, lo:lo + D_HEAD], v[:, lo:lo + D_HEAD]
            s = (qs @ ks.T) / jnp.sqrt(jnp.float32(D_HEAD))
            s = jnp.where(mask == 0, NEG_INF, s)
            p = jax.nn.softmax(s, axis=-1)
            outs.append(p @ vs)
        return jnp.concatenate(outs, axis=-1) @ wo.T

    def ffn(t):
        h = jnp.maximum(t @ ff_w1.T + ff_b1, 0.0)
        return h @ ff_w2.T + ff_b2

    def one(xb, eb, smb, tmb):
        xn = layer_norm(xb, ln1_a, ln1_b)
        xb = xb + mha(xn, xn, sa_wq, sa_wk, sa_wv, sa_wo, tmb)
        xn = layer_norm(xb, ln2_a, ln2_b)
        xb = xb + mha(xn, eb, ca_wq, ca_wk, ca_wv, ca_wo, smb)
        xn = layer_norm(xb, ln3_a, ln3_b)
        return xb + ffn(xn)

    return jax.vmap(one)(x, enc_out, src_mask, tgt_mask)


# ----------------------------------------------------------------------------
# Deterministic parameter init (shapes as implied by the module __init__).
# ----------------------------------------------------------------------------
def init_params(key):
    ks = jax.random.split(key, 12)
    w = lambda k, shape: (0.1 * jax.random.normal(k, shape)).astype(jnp.float32)
    sa_wq = w(ks[0], (D_MODEL, D_MODEL)); sa_wk = w(ks[1], (D_MODEL, D_MODEL))
    sa_wv = w(ks[2], (D_MODEL, D_MODEL)); sa_wo = w(ks[3], (D_MODEL, D_MODEL))
    ca_wq = w(ks[4], (D_MODEL, D_MODEL)); ca_wk = w(ks[5], (D_MODEL, D_MODEL))
    ca_wv = w(ks[6], (D_MODEL, D_MODEL)); ca_wo = w(ks[7], (D_MODEL, D_MODEL))
    ff_w1 = w(ks[8], (D_FF, D_MODEL));    ff_w2 = w(ks[9], (D_MODEL, D_FF))
    ff_b1 = w(ks[10], (1, D_FF));         ff_b2 = w(ks[11], (1, D_MODEL))
    ln_a = jnp.ones((1, D_MODEL), jnp.float32)
    ln_b = jnp.zeros((1, D_MODEL), jnp.float32)
    return (sa_wq, sa_wk, sa_wv, sa_wo,
            ca_wq, ca_wk, ca_wv, ca_wo,
            ff_w1, ff_b1, ff_w2, ff_b2,
            ln_a, ln_b, ln_a, ln_b, ln_a, ln_b)


if __name__ == "__main__":
    B, S_TGT, S_SRC = 2, 8, 8
    key = jax.random.PRNGKey(0)
    kx, ke, kp = jax.random.split(key, 3)

    x = jax.random.normal(kx, (B, S_TGT, D_MODEL), dtype=jnp.float32)
    enc_out = jax.random.normal(ke, (B, S_SRC, D_MODEL), dtype=jnp.float32)

    # Causal target mask; source mask with the last position padded out.
    tgt_mask = jnp.broadcast_to(jnp.tril(jnp.ones((S_TGT, S_TGT), jnp.float32)),
                                (B, S_TGT, S_TGT))
    src_mask = jnp.ones((B, 1, S_SRC), jnp.float32).at[:, :, -1].set(0.0)

    params = init_params(kp)

    out = jax.block_until_ready(decoder_block(x, enc_out, src_mask, tgt_mask, params))
    ref = decoder_block_ref(x, enc_out, src_mask, tgt_mask, params)

    assert out.shape == (B, S_TGT, D_MODEL)
    # Exact LayerNorm reciprocal lets us tighten the check; only the softmax
    # denominator uses the approximate EUP reciprocal.
    assert jnp.allclose(out, ref, rtol=5e-3, atol=5e-3), "mismatch vs JAX reference"

    print("KERNEL_OK")
</pallas_src>

<mosaic_0001>
module attributes {stable_mosaic.version = 11 : i64} {
  func.func @decoder_block_kernel(%arg0: i32, %arg1: memref<1x8x32xf32, #tpu.memory_space<vmem>>, %arg2: memref<1x8x32xf32, #tpu.memory_space<vmem>>, %arg3: memref<1x8x8xf32, #tpu.memory_space<vmem>>, %arg4: memref<1x1x8xf32, #tpu.memory_space<vmem>>, %arg5: memref<32x32xf32, #tpu.memory_space<vmem>>, %arg6: memref<32x32xf32, #tpu.memory_space<vmem>>, %arg7: memref<32x32xf32, #tpu.memory_space<vmem>>, %arg8: memref<32x32xf32, #tpu.memory_space<vmem>>, %arg9: memref<32x32xf32, #tpu.memory_space<vmem>>, %arg10: memref<32x32xf32, #tpu.memory_space<vmem>>, %arg11: memref<32x32xf32, #tpu.memory_space<vmem>>, %arg12: memref<32x32xf32, #tpu.memory_space<vmem>>, %arg13: memref<32x64xf32, #tpu.memory_space<vmem>>, %arg14: memref<1x64xf32, #tpu.memory_space<vmem>>, %arg15: memref<64x32xf32, #tpu.memory_space<vmem>>, %arg16: memref<1x32xf32, #tpu.memory_space<vmem>>, %arg17: memref<1x32xf32, #tpu.memory_space<vmem>>, %arg18: memref<1x32xf32, #tpu.memory_space<vmem>>, %arg19: memref<1x32xf32, #tpu.memory_space<vmem>>, %arg20: memref<1x32xf32, #tpu.memory_space<vmem>>, %arg21: memref<1x32xf32, #tpu.memory_space<vmem>>, %arg22: memref<1x32xf32, #tpu.memory_space<vmem>>, %arg23: memref<1x8x32xf32, #tpu.memory_space<vmem>>) attributes {dimension_semantics = [#tpu.dimension_semantics<parallel>], iteration_bounds = array<i64: 2>, scalar_prefetch = 0 : i64, scratch_operands = 0 : i64, tpu.core_type = #tpu.core_type<tc>, window_params = [{transform_indices = @transform_0, window_bounds = array<i64: 1, 8, 32>}, {transform_indices = @transform_1, window_bounds = array<i64: 1, 8, 32>}, {transform_indices = @transform_2, window_bounds = array<i64: 1, 8, 8>}, {transform_indices = @transform_3, window_bounds = array<i64: 1, 1, 8>}, {pipeline_mode = #tpu.pipeline_mode<synchronous>, transform_indices = @transform_4, window_bounds = array<i64: 32, 32>}, {pipeline_mode = #tpu.pipeline_mode<synchronous>, transform_indices = @transform_5, window_bounds = array<i64: 32, 32>}, {pipeline_mode = #tpu.pipeline_mode<synchronous>, transform_indices = @transform_6, window_bounds = array<i64: 32, 32>}, {pipeline_mode = #tpu.pipeline_mode<synchronous>, transform_indices = @transform_7, window_bounds = array<i64: 32, 32>}, {pipeline_mode = #tpu.pipeline_mode<synchronous>, transform_indices = @transform_8, window_bounds = array<i64: 32, 32>}, {pipeline_mode = #tpu.pipeline_mode<synchronous>, transform_indices = @transform_9, window_bounds = array<i64: 32, 32>}, {pipeline_mode = #tpu.pipeline_mode<synchronous>, transform_indices = @transform_10, window_bounds = array<i64: 32, 32>}, {pipeline_mode = #tpu.pipeline_mode<synchronous>, transform_indices = @transform_11, window_bounds = array<i64: 32, 32>}, {pipeline_mode = #tpu.pipeline_mode<synchronous>, transform_indices = @transform_12, window_bounds = array<i64: 32, 64>}, {pipeline_mode = #tpu.pipeline_mode<synchronous>, transform_indices = @transform_13, window_bounds = array<i64: 1, 64>}, {pipeline_mode = #tpu.pipeline_mode<synchronous>, transform_indices = @transform_14, window_bounds = array<i64: 64, 32>}, {pipeline_mode = #tpu.pipeline_mode<synchronous>, transform_indices = @transform_15, window_bounds = array<i64: 1, 32>}, {pipeline_mode = #tpu.pipeline_mode<synchronous>, transform_indices = @transform_16, window_bounds = array<i64: 1, 32>}, {pipeline_mode = #tpu.pipeline_mode<synchronous>, transform_indices = @transform_17, window_bounds = array<i64: 1, 32>}, {pipeline_mode = #tpu.pipeline_mode<synchronous>, transform_indices = @transform_18, window_bounds = array<i64: 1, 32>}, {pipeline_mode = #tpu.pipeline_mode<synchronous>, transform_indices = @transform_19, window_bounds = array<i64: 1, 32>}, {pipeline_mode = #tpu.pipeline_mode<synchronous>, transform_indices = @transform_20, window_bounds = array<i64: 1, 32>}, {pipeline_mode = #tpu.pipeline_mode<synchronous>, transform_indices = @transform_21, window_bounds = array<i64: 1, 32>}, {transform_indices = @transform_22, window_bounds = array<i64: 1, 8, 32>}]} {
    %c0 = arith.constant 0 : index
    %c0_0 = arith.constant 0 : index
    %c0_1 = arith.constant 0 : index
    %0 = vector.load %arg1[%c0, %c0_0, %c0_1] : memref<1x8x32xf32, #tpu.memory_space<vmem>>, vector<1x8x32xf32>
    %1 = vector.shape_cast %0 : vector<1x8x32xf32> to vector<8x32xf32>
    %c0_2 = arith.constant 0 : index
    %c0_3 = arith.constant 0 : index
    %c0_4 = arith.constant 0 : index
    %2 = vector.load %arg2[%c0_2, %c0_3, %c0_4] : memref<1x8x32xf32, #tpu.memory_space<vmem>>, vector<1x8x32xf32>
    %3 = vector.shape_cast %2 : vector<1x8x32xf32> to vector<8x32xf32>
    %c0_5 = arith.constant 0 : index
    %c0_6 = arith.constant 0 : index
    %c0_7 = arith.constant 0 : index
    %4 = vector.load %arg3[%c0_5, %c0_6, %c0_7] : memref<1x8x8xf32, #tpu.memory_space<vmem>>, vector<1x8x8xf32>
    %5 = vector.shape_cast %4 : vector<1x8x8xf32> to vector<8x8xf32>
    %c0_8 = arith.constant 0 : index
    %c0_9 = arith.constant 0 : index
    %c0_10 = arith.constant 0 : index
    %6 = vector.load %arg4[%c0_8, %c0_9, %c0_10] : memref<1x1x8xf32, #tpu.memory_space<vmem>>, vector<1x1x8xf32>
    %7 = vector.shape_cast %6 : vector<1x1x8xf32> to vector<1x8xf32>
    %c0_11 = arith.constant 0 : index
    %c0_12 = arith.constant 0 : index
    %8 = vector.load %arg17[%c0_11, %c0_12] : memref<1x32xf32, #tpu.memory_space<vmem>>, vector<1x32xf32>
    %c0_13 = arith.constant 0 : index
    %c0_14 = arith.constant 0 : index
    %9 = vector.load %arg18[%c0_13, %c0_14] : memref<1x32xf32, #tpu.memory_space<vmem>>, vector<1x32xf32>
    %cst = arith.constant dense<0.000000e+00> : vector<8xf32>
    %10 = vector.multi_reduction <add>, %1, %cst [1] : vector<8x32xf32> to vector<8xf32>
    %11 = vector.shape_cast %10 : vector<8xf32> to vector<8x1xf32>
    %cst_15 = arith.constant 3.200000e+01 : f32
    %12 = vector.broadcast %cst_15 : f32 to vector<8x1xf32>
    %13 = arith.divf %11, %12 : vector<8x1xf32>
    %14 = vector.broadcast %13 : vector<8x1xf32> to vector<8x32xf32>
    %15 = arith.subf %1, %14 : vector<8x32xf32>
    %16 = arith.mulf %15, %15 : vector<8x32xf32>
    %cst_16 = arith.constant dense<0.000000e+00> : vector<8xf32>
    %17 = vector.multi_reduction <add>, %16, %cst_16 [1] : vector<8x32xf32> to vector<8xf32>
    %18 = vector.shape_cast %17 : vector<8xf32> to vector<8x1xf32>
    %cst_17 = arith.constant 0.0322580636 : f32
    %19 = vector.broadcast %cst_17 : f32 to vector<8x1xf32>
    %20 = arith.mulf %18, %19 : vector<8x1xf32>
    %21 = math.sqrt %20 : vector<8x1xf32>
    %cst_18 = arith.constant 9.99999997E-7 : f32
    %22 = vector.broadcast %cst_18 : f32 to vector<8x1xf32>
    %23 = arith.addf %21, %22 : vector<8x1xf32>
    %24 = tpu.reciprocal %23 : vector<8x1xf32> -> vector<8x1xf32>
    %25 = vector.broadcast %8 : vector<1x32xf32> to vector<8x32xf32>
    %26 = arith.mulf %25, %15 : vector<8x32xf32>
    %27 = vector.broadcast %24 : vector<8x1xf32> to vector<8x32xf32>
    %28 = arith.mulf %26, %27 : vector<8x32xf32>
    %29 = vector.broadcast %9 : vector<1x32xf32> to vector<8x32xf32>
    %30 = arith.addf %28, %29 : vector<8x32xf32>
    %c0_19 = arith.constant 0 : index
    %c0_20 = arith.constant 0 : index
    %31 = vector.load %arg5[%c0_19, %c0_20] : memref<32x32xf32, #tpu.memory_space<vmem>>, vector<32x32xf32>
    %c0_21 = arith.constant 0 : index
    %c0_22 = arith.constant 0 : index
    %32 = vector.load %arg6[%c0_21, %c0_22] : memref<32x32xf32, #tpu.memory_space<vmem>>, vector<32x32xf32>
    %c0_23 = arith.constant 0 : index
    %c0_24 = arith.constant 0 : index
    %33 = vector.load %arg7[%c0_23, %c0_24] : memref<32x32xf32, #tpu.memory_space<vmem>>, vector<32x32xf32>
    %c0_25 = arith.constant 0 : index
    %c0_26 = arith.constant 0 : index
    %34 = vector.load %arg8[%c0_25, %c0_26] : memref<32x32xf32, #tpu.memory_space<vmem>>, vector<32x32xf32>
    %cst_27 = arith.constant dense<0.000000e+00> : vector<8x32xf32>
    %35 = tpu.matmul %30, %31, %cst_27 {dimension_numbers = #tpu.dot_dimension_numbers<[1], [0], [0], [1], [0, 0, 1, 1], [], []>} : vector<8x32xf32>, vector<32x32xf32>, vector<8x32xf32> -> vector<8x32xf32>
    %cst_28 = arith.constant 0.353553385 : f32
    %36 = vector.broadcast %cst_28 : f32 to vector<8x32xf32>
    %37 = arith.mulf %35, %36 : vector<8x32xf32>
    %cst_29 = arith.constant dense<0.000000e+00> : vector<8x32xf32>
    %38 = tpu.matmul %30, %32, %cst_29 {dimension_numbers = #tpu.dot_dimension_numbers<[1], [0], [0], [1], [0, 0, 1, 1], [], []>} : vector<8x32xf32>, vector<32x32xf32>, vector<8x32xf32> -> vector<8x32xf32>
    %cst_30 = arith.constant dense<0.000000e+00> : vector<8x32xf32>
    %39 = tpu.matmul %30, %33, %cst_30 {dimension_numbers = #tpu.dot_dimension_numbers<[1], [0], [0], [1], [0, 0, 1, 1], [], []>} : vector<8x32xf32>, vector<32x32xf32>, vector<8x32xf32> -> vector<8x32xf32>
    %cst_31 = arith.constant 0.000000e+00 : f32
    %40 = vector.broadcast %cst_31 : f32 to vector<8x8xf32>
    %41 = arith.cmpf oeq, %5, %40 : vector<8x8xf32>
    %42 = vector.extract_strided_slice %37 {offsets = [0, 0], sizes = [8, 8], strides = [1, 1]} : vector<8x32xf32> to vector<8x8xf32>
    %43 = vector.extract_strided_slice %38 {offsets = [0, 0], sizes = [8, 8], strides = [1, 1]} : vector<8x32xf32> to vector<8x8xf32>
    %44 = vector.extract_strided_slice %39 {offsets = [0, 0], sizes = [8, 8], strides = [1, 1]} : vector<8x32xf32> to vector<8x8xf32>
    %cst_32 = arith.constant dense<0.000000e+00> : vector<8x8xf32>
    %45 = tpu.matmul %42, %43, %cst_32 {dimension_numbers = #tpu.dot_dimension_numbers<[1], [1], [0], [0], [0, 0, 1, 0], [], []>} : vector<8x8xf32>, vector<8x8xf32>, vector<8x8xf32> -> vector<8x8xf32>
    %cst_33 = arith.constant -1.000000e+09 : f32
    %46 = vector.broadcast %cst_33 : f32 to vector<8x8xf32>
    %47 = arith.select %41, %46, %45 : vector<8x8xi1>, vector<8x8xf32>
    %cst_34 = arith.constant dense<0xFF800000> : vector<8xf32>
    %48 = vector.multi_reduction <maximumf>, %47, %cst_34 [1] : vector<8x8xf32> to vector<8xf32>
    %49 = vector.shape_cast %48 : vector<8xf32> to vector<8x1xf32>
    %50 = vector.broadcast %49 : vector<8x1xf32> to vector<8x8xf32>
    %51 = arith.subf %47, %50 : vector<8x8xf32>
    %52 = math.exp %51 : vector<8x8xf32>
    %cst_35 = arith.constant dense<0.000000e+00> : vector<8xf32>
    %53 = vector.multi_reduction <add>, %52, %cst_35 [1] : vector<8x8xf32> to vector<8xf32>
    %54 = vector.shape_cast %53 : vector<8xf32> to vector<8x1xf32>
    %55 = tpu.reciprocal %54 {approx = true} : vector<8x1xf32> -> vector<8x1xf32>
    %cst_36 = arith.constant dense<0.000000e+00> : vector<8x8xf32>
    %56 = tpu.matmul %52, %44, %cst_36 {dimension_numbers = #tpu.dot_dimension_numbers<[1], [0], [0], [1], [0, 0, 1, 1], [], []>} : vector<8x8xf32>, vector<8x8xf32>, vector<8x8xf32> -> vector<8x8xf32>
    %57 = vector.broadcast %55 : vector<8x1xf32> to vector<8x8xf32>
    %58 = arith.mulf %56, %57 : vector<8x8xf32>
    %59 = vector.extract_strided_slice %34 {offsets = [0, 0], sizes = [8, 32], strides = [1, 1]} : vector<32x32xf32> to vector<8x32xf32>
    %cst_37 = arith.constant dense<0.000000e+00> : vector<8x32xf32>
    %60 = tpu.matmul %58, %59, %cst_37 {dimension_numbers = #tpu.dot_dimension_numbers<[1], [0], [0], [1], [0, 0, 1, 1], [], []>} : vector<8x8xf32>, vector<8x32xf32>, vector<8x32xf32> -> vector<8x32xf32>
    %61 = vector.extract_strided_slice %37 {offsets = [0, 8], sizes = [8, 8], strides = [1, 1]} : vector<8x32xf32> to vector<8x8xf32>
    %62 = vector.extract_strided_slice %38 {offsets = [0, 8], sizes = [8, 8], strides = [1, 1]} : vector<8x32xf32> to vector<8x8xf32>
    %63 = vector.extract_strided_slice %39 {offsets = [0, 8], sizes = [8, 8], strides = [1, 1]} : vector<8x32xf32> to vector<8x8xf32>
    %cst_38 = arith.constant dense<0.000000e+00> : vector<8x8xf32>
    %64 = tpu.matmul %61, %62, %cst_38 {dimension_numbers = #tpu.dot_dimension_numbers<[1], [1], [0], [0], [0, 0, 1, 0], [], []>} : vector<8x8xf32>, vector<8x8xf32>, vector<8x8xf32> -> vector<8x8xf32>
    %cst_39 = arith.constant -1.000000e+09 : f32
    %65 = vector.broadcast %cst_39 : f32 to vector<8x8xf32>
    %66 = arith.select %41, %65, %64 : vector<8x8xi1>, vector<8x8xf32>
    %cst_40 = arith.constant dense<0xFF800000> : vector<8xf32>
    %67 = vector.multi_reduction <maximumf>, %66, %cst_40 [1] : vector<8x8xf32> to vector<8xf32>
    %68 = vector.shape_cast %67 : vector<8xf32> to vector<8x1xf32>
    %69 = vector.broadcast %68 : vector<8x1xf32> to vector<8x8xf32>
    %70 = arith.subf %66, %69 : vector<8x8xf32>
    %71 = math.exp %70 : vector<8x8xf32>
    %cst_41 = arith.constant dense<0.000000e+00> : vector<8xf32>
    %72 = vector.multi_reduction <add>, %71, %cst_41 [1] : vector<8x8xf32> to vector<8xf32>
    %73 = vector.shape_cast %72 : vector<8xf32> to vector<8x1xf32>
    %74 = tpu.reciprocal %73 {approx = true} : vector<8x1xf32> -> vector<8x1xf32>
    %cst_42 = arith.constant dense<0.000000e+00> : vector<8x8xf32>
    %75 = tpu.matmul %71, %63, %cst_42 {dimension_numbers = #tpu.dot_dimension_numbers<[1], [0], [0], [1], [0, 0, 1, 1], [], []>} : vector<8x8xf32>, vector<8x8xf32>, vector<8x8xf32> -> vector<8x8xf32>
    %76 = vector.broadcast %74 : vector<8x1xf32> to vector<8x8xf32>
    %77 = arith.mulf %75, %76 : vector<8x8xf32>
    %78 = vector.extract_strided_slice %34 {offsets = [8, 0], sizes = [8, 32], strides = [1, 1]} : vector<32x32xf32> to vector<8x32xf32>
    %cst_43 = arith.constant dense<0.000000e+00> : vector<8x32xf32>
    %79 = tpu.matmul %77, %78, %cst_43 {dimension_numbers = #tpu.dot_dimension_numbers<[1], [0], [0], [1], [0, 0, 1, 1], [], []>} : vector<8x8xf32>, vector<8x32xf32>, vector<8x32xf32> -> vector<8x32xf32>
    %80 = arith.addf %60, %79 : vector<8x32xf32>
    %81 = vector.extract_strided_slice %37 {offsets = [0, 16], sizes = [8, 8], strides = [1, 1]} : vector<8x32xf32> to vector<8x8xf32>
    %82 = vector.extract_strided_slice %38 {offsets = [0, 16], sizes = [8, 8], strides = [1, 1]} : vector<8x32xf32> to vector<8x8xf32>
    %83 = vector.extract_strided_slice %39 {offsets = [0, 16], sizes = [8, 8], strides = [1, 1]} : vector<8x32xf32> to vector<8x8xf32>
    %cst_44 = arith.constant dense<0.000000e+00> : vector<8x8xf32>
    %84 = tpu.matmul %81, %82, %cst_44 {dimension_numbers = #tpu.dot_dimension_numbers<[1], [1], [0], [0], [0, 0, 1, 0], [], []>} : vector<8x8xf32>, vector<8x8xf32>, vector<8x8xf32> -> vector<8x8xf32>
    %cst_45 = arith.constant -1.000000e+09 : f32
    %85 = vector.broadcast %cst_45 : f32 to vector<8x8xf32>
    %86 = arith.select %41, %85, %84 : vector<8x8xi1>, vector<8x8xf32>
    %cst_46 = arith.constant dense<0xFF800000> : vector<8xf32>
    %87 = vector.multi_reduction <maximumf>, %86, %cst_46 [1] : vector<8x8xf32> to vector<8xf32>
    %88 = vector.shape_cast %87 : vector<8xf32> to vector<8x1xf32>
    %89 = vector.broadcast %88 : vector<8x1xf32> to vector<8x8xf32>
    %90 = arith.subf %86, %89 : vector<8x8xf32>
    %91 = math.exp %90 : vector<8x8xf32>
    %cst_47 = arith.constant dense<0.000000e+00> : vector<8xf32>
    %92 = vector.multi_reduction <add>, %91, %cst_47 [1] : vector<8x8xf32> to vector<8xf32>
    %93 = vector.shape_cast %92 : vector<8xf32> to vector<8x1xf32>
    %94 = tpu.reciprocal %93 {approx = true} : vector<8x1xf32> -> vector<8x1xf32>
    %cst_48 = arith.constant dense<0.000000e+00> : vector<8x8xf32>
    %95 = tpu.matmul %91, %83, %cst_48 {dimension_numbers = #tpu.dot_dimension_numbers<[1], [0], [0], [1], [0, 0, 1, 1], [], []>} : vector<8x8xf32>, vector<8x8xf32>, vector<8x8xf32> -> vector<8x8xf32>
    %96 = vector.broadcast %94 : vector<8x1xf32> to vector<8x8xf32>
    %97 = arith.mulf %95, %96 : vector<8x8xf32>
    %98 = vector.extract_strided_slice %34 {offsets = [16, 0], sizes = [8, 32], strides = [1, 1]} : vector<32x32xf32> to vector<8x32xf32>
    %cst_49 = arith.constant dense<0.000000e+00> : vector<8x32xf32>
    %99 = tpu.matmul %97, %98, %cst_49 {dimension_numbers = #tpu.dot_dimension_numbers<[1], [0], [0], [1], [0, 0, 1, 1], [], []>} : vector<8x8xf32>, vector<8x32xf32>, vector<8x32xf32> -> vector<8x32xf32>
    %100 = arith.addf %80, %99 : vector<8x32xf32>
    %101 = vector.extract_strided_slice %37 {offsets = [0, 24], sizes = [8, 8], strides = [1, 1]} : vector<8x32xf32> to vector<8x8xf32>
    %102 = vector.extract_strided_slice %38 {offsets = [0, 24], sizes = [8, 8], strides = [1, 1]} : vector<8x32xf32> to vector<8x8xf32>
    %103 = vector.extract_strided_slice %39 {offsets = [0, 24], sizes = [8, 8], strides = [1, 1]} : vector<8x32xf32> to vector<8x8xf32>
    %cst_50 = arith.constant dense<0.000000e+00> : vector<8x8xf32>
    %104 = tpu.matmul %101, %102, %cst_50 {dimension_numbers = #tpu.dot_dimension_numbers<[1], [1], [0], [0], [0, 0, 1, 0], [], []>} : vector<8x8xf32>, vector<8x8xf32>, vector<8x8xf32> -> vector<8x8xf32>
    %cst_51 = arith.constant -1.000000e+09 : f32
    %105 = vector.broadcast %cst_51 : f32 to vector<8x8xf32>
    %106 = arith.select %41, %105, %104 : vector<8x8xi1>, vector<8x8xf32>
    %cst_52 = arith.constant dense<0xFF800000> : vector<8xf32>
    %107 = vector.multi_reduction <maximumf>, %106, %cst_52 [1] : vector<8x8xf32> to vector<8xf32>
    %108 = vector.shape_cast %107 : vector<8xf32> to vector<8x1xf32>
    %109 = vector.broadcast %108 : vector<8x1xf32> to vector<8x8xf32>
    %110 = arith.subf %106, %109 : vector<8x8xf32>
    %111 = math.exp %110 : vector<8x8xf32>
    %cst_53 = arith.constant dense<0.000000e+00> : vector<8xf32>
    %112 = vector.multi_reduction <add>, %111, %cst_53 [1] : vector<8x8xf32> to vector<8xf32>
    %113 = vector.shape_cast %112 : vector<8xf32> to vector<8x1xf32>
    %114 = tpu.reciprocal %113 {approx = true} : vector<8x1xf32> -> vector<8x1xf32>
    %cst_54 = arith.constant dense<0.000000e+00> : vector<8x8xf32>
    %115 = tpu.matmul %111, %103, %cst_54 {dimension_numbers = #tpu.dot_dimension_numbers<[1], [0], [0], [1], [0, 0, 1, 1], [], []>} : vector<8x8xf32>, vector<8x8xf32>, vector<8x8xf32> -> vector<8x8xf32>
    %116 = vector.broadcast %114 : vector<8x1xf32> to vector<8x8xf32>
    %117 = arith.mulf %115, %116 : vector<8x8xf32>
    %118 = vector.extract_strided_slice %34 {offsets = [24, 0], sizes = [8, 32], strides = [1, 1]} : vector<32x32xf32> to vector<8x32xf32>
    %cst_55 = arith.constant dense<0.000000e+00> : vector<8x32xf32>
    %119 = tpu.matmul %117, %118, %cst_55 {dimension_numbers = #tpu.dot_dimension_numbers<[1], [0], [0], [1], [0, 0, 1, 1], [], []>} : vector<8x8xf32>, vector<8x32xf32>, vector<8x32xf32> -> vector<8x32xf32>
    %120 = arith.addf %100, %119 : vector<8x32xf32>
    %121 = arith.addf %1, %120 : vector<8x32xf32>
    %c0_56 = arith.constant 0 : index
    %c0_57 = arith.constant 0 : index
    %122 = vector.load %arg19[%c0_56, %c0_57] : memref<1x32xf32, #tpu.memory_space<vmem>>, vector<1x32xf32>
    %c0_58 = arith.constant 0 : index
    %c0_59 = arith.constant 0 : index
    %123 = vector.load %arg20[%c0_58, %c0_59] : memref<1x32xf32, #tpu.memory_space<vmem>>, vector<1x32xf32>
    %cst_60 = arith.constant dense<0.000000e+00> : vector<8xf32>
    %124 = vector.multi_reduction <add>, %121, %cst_60 [1] : vector<8x32xf32> to vector<8xf32>
    %125 = vector.shape_cast %124 : vector<8xf32> to vector<8x1xf32>
    %cst_61 = arith.constant 3.200000e+01 : f32
    %126 = vector.broadcast %cst_61 : f32 to vector<8x1xf32>
    %127 = arith.divf %125, %126 : vector<8x1xf32>
    %128 = vector.broadcast %127 : vector<8x1xf32> to vector<8x32xf32>
    %129 = arith.subf %121, %128 : vector<8x32xf32>
    %130 = arith.mulf %129, %129 : vector<8x32xf32>
    %cst_62 = arith.constant dense<0.000000e+00> : vector<8xf32>
    %131 = vector.multi_reduction <add>, %130, %cst_62 [1] : vector<8x32xf32> to vector<8xf32>
    %132 = vector.shape_cast %131 : vector<8xf32> to vector<8x1xf32>
    %cst_63 = arith.constant 0.0322580636 : f32
    %133 = vector.broadcast %cst_63 : f32 to vector<8x1xf32>
    %134 = arith.mulf %132, %133 : vector<8x1xf32>
    %135 = math.sqrt %134 : vector<8x1xf32>
    %cst_64 = arith.constant 9.99999997E-7 : f32
    %136 = vector.broadcast %cst_64 : f32 to vector<8x1xf32>
    %137 = arith.addf %135, %136 : vector<8x1xf32>
    %138 = tpu.reciprocal %137 : vector<8x1xf32> -> vector<8x1xf32>
    %139 = vector.broadcast %122 : vector<1x32xf32> to vector<8x32xf32>
    %140 = arith.mulf %139, %129 : vector<8x32xf32>
    %141 = vector.broadcast %138 : vector<8x1xf32> to vector<8x32xf32>
    %142 = arith.mulf %140, %141 : vector<8x32xf32>
    %143 = vector.broadcast %123 : vector<1x32xf32> to vector<8x32xf32>
    %144 = arith.addf %142, %143 : vector<8x32xf32>
    %c0_65 = arith.constant 0 : index
    %c0_66 = arith.constant 0 : index
    %145 = vector.load %arg9[%c0_65, %c0_66] : memref<32x32xf32, #tpu.memory_space<vmem>>, vector<32x32xf32>
    %c0_67 = arith.constant 0 : index
    %c0_68 = arith.constant 0 : index
    %146 = vector.load %arg10[%c0_67, %c0_68] : memref<32x32xf32, #tpu.memory_space<vmem>>, vector<32x32xf32>
    %c0_69 = arith.constant 0 : index
    %c0_70 = arith.constant 0 : index
    %147 = vector.load %arg11[%c0_69, %c0_70] : memref<32x32xf32, #tpu.memory_space<vmem>>, vector<32x32xf32>
    %c0_71 = arith.constant 0 : index
    %c0_72 = arith.constant 0 : index
    %148 = vector.load %arg12[%c0_71, %c0_72] : memref<32x32xf32, #tpu.memory_space<vmem>>, vector<32x32xf32>
    %cst_73 = arith.constant dense<0.000000e+00> : vector<8x32xf32>
    %149 = tpu.matmul %144, %145, %cst_73 {dimension_numbers = #tpu.dot_dimension_numbers<[1], [0], [0], [1], [0, 0, 1, 1], [], []>} : vector<8x32xf32>, vector<32x32xf32>, vector<8x32xf32> -> vector<8x32xf32>
    %cst_74 = arith.constant 0.353553385 : f32
    %150 = vector.broadcast %cst_74 : f32 to vector<8x32xf32>
    %151 = arith.mulf %149, %150 : vector<8x32xf32>
    %cst_75 = arith.constant dense<0.000000e+00> : vector<8x32xf32>
    %152 = tpu.matmul %3, %146, %cst_75 {dimension_numbers = #tpu.dot_dimension_numbers<[1], [0], [0], [1], [0, 0, 1, 1], [], []>} : vector<8x32xf32>, vector<32x32xf32>, vector<8x32xf32> -> vector<8x32xf32>
    %cst_76 = arith.constant dense<0.000000e+00> : vector<8x32xf32>
    %153 = tpu.matmul %3, %147, %cst_76 {dimension_numbers = #tpu.dot_dimension_numbers<[1], [0], [0], [1], [0, 0, 1, 1], [], []>} : vector<8x32xf32>, vector<32x32xf32>, vector<8x32xf32> -> vector<8x32xf32>
    %cst_77 = arith.constant 0.000000e+00 : f32
    %154 = vector.broadcast %cst_77 : f32 to vector<1x8xf32>
    %155 = arith.cmpf oeq, %7, %154 : vector<1x8xf32>
    %156 = vector.extract_strided_slice %151 {offsets = [0, 0], sizes = [8, 8], strides = [1, 1]} : vector<8x32xf32> to vector<8x8xf32>
    %157 = vector.extract_strided_slice %152 {offsets = [0, 0], sizes = [8, 8], strides = [1, 1]} : vector<8x32xf32> to vector<8x8xf32>
    %158 = vector.extract_strided_slice %153 {offsets = [0, 0], sizes = [8, 8], strides = [1, 1]} : vector<8x32xf32> to vector<8x8xf32>
    %cst_78 = arith.constant dense<0.000000e+00> : vector<8x8xf32>
    %159 = tpu.matmul %156, %157, %cst_78 {dimension_numbers = #tpu.dot_dimension_numbers<[1], [1], [0], [0], [0, 0, 1, 0], [], []>} : vector<8x8xf32>, vector<8x8xf32>, vector<8x8xf32> -> vector<8x8xf32>
    %cst_79 = arith.constant -1.000000e+09 : f32
    %160 = vector.shape_cast %155 : vector<1x8xi1> to vector<1x8xi1>
    %161 = vector.broadcast %160 : vector<1x8xi1> to vector<8x8xi1>
    %162 = vector.broadcast %cst_79 : f32 to vector<8x8xf32>
    %163 = arith.select %161, %162, %159 : vector<8x8xi1>, vector<8x8xf32>
    %cst_80 = arith.constant dense<0xFF800000> : vector<8xf32>
    %164 = vector.multi_reduction <maximumf>, %163, %cst_80 [1] : vector<8x8xf32> to vector<8xf32>
    %165 = vector.shape_cast %164 : vector<8xf32> to vector<8x1xf32>
    %166 = vector.broadcast %165 : vector<8x1xf32> to vector<8x8xf32>
    %167 = arith.subf %163, %166 : vector<8x8xf32>
    %168 = math.exp %167 : vector<8x8xf32>
    %cst_81 = arith.constant dense<0.000000e+00> : vector<8xf32>
    %169 = vector.multi_reduction <add>, %168, %cst_81 [1] : vector<8x8xf32> to vector<8xf32>
    %170 = vector.shape_cast %169 : vector<8xf32> to vector<8x1xf32>
    %171 = tpu.reciprocal %170 {approx = true} : vector<8x1xf32> -> vector<8x1xf32>
    %cst_82 = arith.constant dense<0.000000e+00> : vector<8x8xf32>
    %172 = tpu.matmul %168, %158, %cst_82 {dimension_numbers = #tpu.dot_dimension_numbers<[1], [0], [0], [1], [0, 0, 1, 1], [], []>} : vector<8x8xf32>, vector<8x8xf32>, vector<8x8xf32> -> vector<8x8xf32>
    %173 = vector.broadcast %171 : vector<8x1xf32> to vector<8x8xf32>
    %174 = arith.mulf %172, %173 : vector<8x8xf32>
    %175 = vector.extract_strided_slice %148 {offsets = [0, 0], sizes = [8, 32], strides = [1, 1]} : vector<32x32xf32> to vector<8x32xf32>
    %cst_83 = arith.constant dense<0.000000e+00> : vector<8x32xf32>
    %176 = tpu.matmul %174, %175, %cst_83 {dimension_numbers = #tpu.dot_dimension_numbers<[1], [0], [0], [1], [0, 0, 1, 1], [], []>} : vector<8x8xf32>, vector<8x32xf32>, vector<8x32xf32> -> vector<8x32xf32>
    %177 = vector.extract_strided_slice %151 {offsets = [0, 8], sizes = [8, 8], strides = [1, 1]} : vector<8x32xf32> to vector<8x8xf32>
    %178 = vector.extract_strided_slice %152 {offsets = [0, 8], sizes = [8, 8], strides = [1, 1]} : vector<8x32xf32> to vector<8x8xf32>
    %179 = vector.extract_strided_slice %153 {offsets = [0, 8], sizes = [8, 8], strides = [1, 1]} : vector<8x32xf32> to vector<8x8xf32>
    %cst_84 = arith.constant dense<0.000000e+00> : vector<8x8xf32>
    %180 = tpu.matmul %177, %178, %cst_84 {dimension_numbers = #tpu.dot_dimension_numbers<[1], [1], [0], [0], [0, 0, 1, 0], [], []>} : vector<8x8xf32>, vector<8x8xf32>, vector<8x8xf32> -> vector<8x8xf32>
    %cst_85 = arith.constant -1.000000e+09 : f32
    %181 = vector.shape_cast %155 : vector<1x8xi1> to vector<1x8xi1>
    %182 = vector.broadcast %181 : vector<1x8xi1> to vector<8x8xi1>
    %183 = vector.broadcast %cst_85 : f32 to vector<8x8xf32>
    %184 = arith.select %182, %183, %180 : vector<8x8xi1>, vector<8x8xf32>
    %cst_86 = arith.constant dense<0xFF800000> : vector<8xf32>
    %185 = vector.multi_reduction <maximumf>, %184, %cst_86 [1] : vector<8x8xf32> to vector<8xf32>
    %186 = vector.shape_cast %185 : vector<8xf32> to vector<8x1xf32>
    %187 = vector.broadcast %186 : vector<8x1xf32> to vector<8x8xf32>
    %188 = arith.subf %184, %187 : vector<8x8xf32>
    %189 = math.exp %188 : vector<8x8xf32>
    %cst_87 = arith.constant dense<0.000000e+00> : vector<8xf32>
    %190 = vector.multi_reduction <add>, %189, %cst_87 [1] : vector<8x8xf32> to vector<8xf32>
    %191 = vector.shape_cast %190 : vector<8xf32> to vector<8x1xf32>
    %192 = tpu.reciprocal %191 {approx = true} : vector<8x1xf32> -> vector<8x1xf32>
    %cst_88 = arith.constant dense<0.000000e+00> : vector<8x8xf32>
    %193 = tpu.matmul %189, %179, %cst_88 {dimension_numbers = #tpu.dot_dimension_numbers<[1], [0], [0], [1], [0, 0, 1, 1], [], []>} : vector<8x8xf32>, vector<8x8xf32>, vector<8x8xf32> -> vector<8x8xf32>
    %194 = vector.broadcast %192 : vector<8x1xf32> to vector<8x8xf32>
    %195 = arith.mulf %193, %194 : vector<8x8xf32>
    %196 = vector.extract_strided_slice %148 {offsets = [8, 0], sizes = [8, 32], strides = [1, 1]} : vector<32x32xf32> to vector<8x32xf32>
    %cst_89 = arith.constant dense<0.000000e+00> : vector<8x32xf32>
    %197 = tpu.matmul %195, %196, %cst_89 {dimension_numbers = #tpu.dot_dimension_numbers<[1], [0], [0], [1], [0, 0, 1, 1], [], []>} : vector<8x8xf32>, vector<8x32xf32>, vector<8x32xf32> -> vector<8x32xf32>
    %198 = arith.addf %176, %197 : vector<8x32xf32>
    %199 = vector.extract_strided_slice %151 {offsets = [0, 16], sizes = [8, 8], strides = [1, 1]} : vector<8x32xf32> to vector<8x8xf32>
    %200 = vector.extract_strided_slice %152 {offsets = [0, 16], sizes = [8, 8], strides = [1, 1]} : vector<8x32xf32> to vector<8x8xf32>
    %201 = vector.extract_strided_slice %153 {offsets = [0, 16], sizes = [8, 8], strides = [1, 1]} : vector<8x32xf32> to vector<8x8xf32>
    %cst_90 = arith.constant dense<0.000000e+00> : vector<8x8xf32>
    %202 = tpu.matmul %199, %200, %cst_90 {dimension_numbers = #tpu.dot_dimension_numbers<[1], [1], [0], [0], [0, 0, 1, 0], [], []>} : vector<8x8xf32>, vector<8x8xf32>, vector<8x8xf32> -> vector<8x8xf32>
    %cst_91 = arith.constant -1.000000e+09 : f32
    %203 = vector.shape_cast %155 : vector<1x8xi1> to vector<1x8xi1>
    %204 = vector.broadcast %203 : vector<1x8xi1> to vector<8x8xi1>
    %205 = vector.broadcast %cst_91 : f32 to vector<8x8xf32>
    %206 = arith.select %204, %205, %202 : vector<8x8xi1>, vector<8x8xf32>
    %cst_92 = arith.constant dense<0xFF800000> : vector<8xf32>
    %207 = vector.multi_reduction <maximumf>, %206, %cst_92 [1] : vector<8x8xf32> to vector<8xf32>
    %208 = vector.shape_cast %207 : vector<8xf32> to vector<8x1xf32>
    %209 = vector.broadcast %208 : vector<8x1xf32> to vector<8x8xf32>
    %210 = arith.subf %206, %209 : vector<8x8xf32>
    %211 = math.exp %210 : vector<8x8xf32>
    %cst_93 = arith.constant dense<0.000000e+00> : vector<8xf32>
    %212 = vector.multi_reduction <add>, %211, %cst_93 [1] : vector<8x8xf32> to vector<8xf32>
    %213 = vector.shape_cast %212 : vector<8xf32> to vector<8x1xf32>
    %214 = tpu.reciprocal %213 {approx = true} : vector<8x1xf32> -> vector<8x1xf32>
    %cst_94 = arith.constant dense<0.000000e+00> : vector<8x8xf32>
    %215 = tpu.matmul %211, %201, %cst_94 {dimension_numbers = #tpu.dot_dimension_numbers<[1], [0], [0], [1], [0, 0, 1, 1], [], []>} : vector<8x8xf32>, vector<8x8xf32>, vector<8x8xf32> -> vector<8x8xf32>
    %216 = vector.broadcast %214 : vector<8x1xf32> to vector<8x8xf32>
    %217 = arith.mulf %215, %216 : vector<8x8xf32>
    %218 = vector.extract_strided_slice %148 {offsets = [16, 0], sizes = [8, 32], strides = [1, 1]} : vector<32x32xf32> to vector<8x32xf32>
    %cst_95 = arith.constant dense<0.000000e+00> : vector<8x32xf32>
    %219 = tpu.matmul %217, %218, %cst_95 {dimension_numbers = #tpu.dot_dimension_numbers<[1], [0], [0], [1], [0, 0, 1, 1], [], []>} : vector<8x8xf32>, vector<8x32xf32>, vector<8x32xf32> -> vector<8x32xf32>
    %220 = arith.addf %198, %219 : vector<8x32xf32>
    %221 = vector.extract_strided_slice %151 {offsets = [0, 24], sizes = [8, 8], strides = [1, 1]} : vector<8x32xf32> to vector<8x8xf32>
    %222 = vector.extract_strided_slice %152 {offsets = [0, 24], sizes = [8, 8], strides = [1, 1]} : vector<8x32xf32> to vector<8x8xf32>
    %223 = vector.extract_strided_slice %153 {offsets = [0, 24], sizes = [8, 8], strides = [1, 1]} : vector<8x32xf32> to vector<8x8xf32>
    %cst_96 = arith.constant dense<0.000000e+00> : vector<8x8xf32>
    %224 = tpu.matmul %221, %222, %cst_96 {dimension_numbers = #tpu.dot_dimension_numbers<[1], [1], [0], [0], [0, 0, 1, 0], [], []>} : vector<8x8xf32>, vector<8x8xf32>, vector<8x8xf32> -> vector<8x8xf32>
    %cst_97 = arith.constant -1.000000e+09 : f32
    %225 = vector.shape_cast %155 : vector<1x8xi1> to vector<1x8xi1>
    %226 = vector.broadcast %225 : vector<1x8xi1> to vector<8x8xi1>
    %227 = vector.broadcast %cst_97 : f32 to vector<8x8xf32>
    %228 = arith.select %226, %227, %224 : vector<8x8xi1>, vector<8x8xf32>
    %cst_98 = arith.constant dense<0xFF800000> : vector<8xf32>
    %229 = vector.multi_reduction <maximumf>, %228, %cst_98 [1] : vector<8x8xf32> to vector<8xf32>
    %230 = vector.shape_cast %229 : vector<8xf32> to vector<8x1xf32>
    %231 = vector.broadcast %230 : vector<8x1xf32> to vector<8x8xf32>
    %232 = arith.subf %228, %231 : vector<8x8xf32>
    %233 = math.exp %232 : vector<8x8xf32>
    %cst_99 = arith.constant dense<0.000000e+00> : vector<8xf32>
    %234 = vector.multi_reduction <add>, %233, %cst_99 [1] : vector<8x8xf32> to vector<8xf32>
    %235 = vector.shape_cast %234 : vector<8xf32> to vector<8x1xf32>
    %236 = tpu.reciprocal %235 {approx = true} : vector<8x1xf32> -> vector<8x1xf32>
    %cst_100 = arith.constant dense<0.000000e+00> : vector<8x8xf32>
    %237 = tpu.matmul %233, %223, %cst_100 {dimension_numbers = #tpu.dot_dimension_numbers<[1], [0], [0], [1], [0, 0, 1, 1], [], []>} : vector<8x8xf32>, vector<8x8xf32>, vector<8x8xf32> -> vector<8x8xf32>
    %238 = vector.broadcast %236 : vector<8x1xf32> to vector<8x8xf32>
    %239 = arith.mulf %237, %238 : vector<8x8xf32>
    %240 = vector.extract_strided_slice %148 {offsets = [24, 0], sizes = [8, 32], strides = [1, 1]} : vector<32x32xf32> to vector<8x32xf32>
    %cst_101 = arith.constant dense<0.000000e+00> : vector<8x32xf32>
    %241 = tpu.matmul %239, %240, %cst_101 {dimension_numbers = #tpu.dot_dimension_numbers<[1], [0], [0], [1], [0, 0, 1, 1], [], []>} : vector<8x8xf32>, vector<8x32xf32>, vector<8x32xf32> -> vector<8x32xf32>
    %242 = arith.addf %220, %241 : vector<8x32xf32>
    %243 = arith.addf %121, %242 : vector<8x32xf32>
    %c0_102 = arith.constant 0 : index
    %c0_103 = arith.constant 0 : index
    %244 = vector.load %arg21[%c0_102, %c0_103] : memref<1x32xf32, #tpu.memory_space<vmem>>, vector<1x32xf32>
    %c0_104 = arith.constant 0 : index
    %c0_105 = arith.constant 0 : index
    %245 = vector.load %arg22[%c0_104, %c0_105] : memref<1x32xf32, #tpu.memory_space<vmem>>, vector<1x32xf32>
    %cst_106 = arith.constant dense<0.000000e+00> : vector<8xf32>
    %246 = vector.multi_reduction <add>, %243, %cst_106 [1] : vector<8x32xf32> to vector<8xf32>
    %247 = vector.shape_cast %246 : vector<8xf32> to vector<8x1xf32>
    %cst_107 = arith.constant 3.200000e+01 : f32
    %248 = vector.broadcast %cst_107 : f32 to vector<8x1xf32>
    %249 = arith.divf %247, %248 : vector<8x1xf32>
    %250 = vector.broadcast %249 : vector<8x1xf32> to vector<8x32xf32>
    %251 = arith.subf %243, %250 : vector<8x32xf32>
    %252 = arith.mulf %251, %251 : vector<8x32xf32>
    %cst_108 = arith.constant dense<0.000000e+00> : vector<8xf32>
    %253 = vector.multi_reduction <add>, %252, %cst_108 [1] : vector<8x32xf32> to vector<8xf32>
    %254 = vector.shape_cast %253 : vector<8xf32> to vector<8x1xf32>
    %cst_109 = arith.constant 0.0322580636 : f32
    %255 = vector.broadcast %cst_109 : f32 to vector<8x1xf32>
    %256 = arith.mulf %254, %255 : vector<8x1xf32>
    %257 = math.sqrt %256 : vector<8x1xf32>
    %cst_110 = arith.constant 9.99999997E-7 : f32
    %258 = vector.broadcast %cst_110 : f32 to vector<8x1xf32>
    %259 = arith.addf %257, %258 : vector<8x1xf32>
    %260 = tpu.reciprocal %259 : vector<8x1xf32> -> vector<8x1xf32>
    %261 = vector.broadcast %244 : vector<1x32xf32> to vector<8x32xf32>
    %262 = arith.mulf %261, %251 : vector<8x32xf32>
    %263 = vector.broadcast %260 : vector<8x1xf32> to vector<8x32xf32>
    %264 = arith.mulf %262, %263 : vector<8x32xf32>
    %265 = vector.broadcast %245 : vector<1x32xf32> to vector<8x32xf32>
    %266 = arith.addf %264, %265 : vector<8x32xf32>
    %c0_111 = arith.constant 0 : index
    %c0_112 = arith.constant 0 : index
    %267 = vector.load %arg13[%c0_111, %c0_112] : memref<32x64xf32, #tpu.memory_space<vmem>>, vector<32x64xf32>
    %c0_113 = arith.constant 0 : index
    %c0_114 = arith.constant 0 : index
    %268 = vector.load %arg14[%c0_113, %c0_114] : memref<1x64xf32, #tpu.memory_space<vmem>>, vector<1x64xf32>
    %c0_115 = arith.constant 0 : index
    %c0_116 = arith.constant 0 : index
    %269 = vector.load %arg15[%c0_115, %c0_116] : memref<64x32xf32, #tpu.memory_space<vmem>>, vector<64x32xf32>
    %c0_117 = arith.constant 0 : index
    %c0_118 = arith.constant 0 : index
    %270 = vector.load %arg16[%c0_117, %c0_118] : memref<1x32xf32, #tpu.memory_space<vmem>>, vector<1x32xf32>
    %cst_119 = arith.constant dense<0.000000e+00> : vector<8x64xf32>
    %271 = tpu.matmul %266, %267, %cst_119 {dimension_numbers = #tpu.dot_dimension_numbers<[1], [0], [0], [1], [0, 0, 1, 1], [], []>} : vector<8x32xf32>, vector<32x64xf32>, vector<8x64xf32> -> vector<8x64xf32>
    %272 = vector.broadcast %268 : vector<1x64xf32> to vector<8x64xf32>
    %273 = arith.addf %271, %272 : vector<8x64xf32>
    %cst_120 = arith.constant 0.000000e+00 : f32
    %274 = vector.broadcast %cst_120 : f32 to vector<8x64xf32>
    %275 = arith.maximumf %273, %274 : vector<8x64xf32>
    %cst_121 = arith.constant dense<0.000000e+00> : vector<8x32xf32>
    %276 = tpu.matmul %275, %269, %cst_121 {dimension_numbers = #tpu.dot_dimension_numbers<[1], [0], [0], [1], [0, 0, 1, 1], [], []>} : vector<8x64xf32>, vector<64x32xf32>, vector<8x32xf32> -> vector<8x32xf32>
    %277 = vector.broadcast %270 : vector<1x32xf32> to vector<8x32xf32>
    %278 = arith.addf %276, %277 : vector<8x32xf32>
    %279 = arith.addf %243, %278 : vector<8x32xf32>
    %c0_122 = arith.constant 0 : index
    %c0_123 = arith.constant 0 : index
    %c0_124 = arith.constant 0 : index
    %280 = vector.load %arg23[%c0_122, %c0_123, %c0_124] : memref<1x8x32xf32, #tpu.memory_space<vmem>>, vector<1x8x32xf32>
    %281 = vector.shape_cast %280 : vector<1x8x32xf32> to vector<8x32xf32>
    %282 = vector.shape_cast %279 : vector<8x32xf32> to vector<1x8x32xf32>
    tpu.vector_store %arg23[%c0_122, %c0_123, %c0_124], %282 {strides = array<i32>} : memref<1x8x32xf32, #tpu.memory_space<vmem>>, vector<1x8x32xf32>,
    return
  }
  func.func @transform_0(%arg0: i32) -> (i32, i32, i32) {
    %c0_i32 = arith.constant 0 : i32
    %c0_i32_0 = arith.constant 0 : i32
    %c0_i32_1 = arith.constant 0 : i32
    return %arg0, %c0_i32, %c0_i32_0 : i32, i32, i32
  }
  func.func @transform_1(%arg0: i32) -> (i32, i32, i32) {
    %c0_i32 = arith.constant 0 : i32
    %c0_i32_0 = arith.constant 0 : i32
    %c0_i32_1 = arith.constant 0 : i32
    return %arg0, %c0_i32, %c0_i32_0 : i32, i32, i32
  }
  func.func @transform_2(%arg0: i32) -> (i32, i32, i32) {
    %c0_i32 = arith.constant 0 : i32
    %c0_i32_0 = arith.constant 0 : i32
    %c0_i32_1 = arith.constant 0 : i32
    return %arg0, %c0_i32, %c0_i32_0 : i32, i32, i32
  }
  func.func @transform_3(%arg0: i32) -> (i32, i32, i32) {
    %c0_i32 = arith.constant 0 : i32
    %c0_i32_0 = arith.constant 0 : i32
    %c0_i32_1 = arith.constant 0 : i32
    return %arg0, %c0_i32, %c0_i32_0 : i32, i32, i32
  }
  func.func @transform_4(%arg0: i32) -> (i32, i32) {
    %c0_i32 = arith.constant 0 : i32
    %c0_i32_0 = arith.constant 0 : i32
    %c0_i32_1 = arith.constant 0 : i32
    return %c0_i32, %c0_i32_0 : i32, i32
  }
  func.func @transform_5(%arg0: i32) -> (i32, i32) {
    %c0_i32 = arith.constant 0 : i32
    %c0_i32_0 = arith.constant 0 : i32
    %c0_i32_1 = arith.constant 0 : i32
    return %c0_i32, %c0_i32_0 : i32, i32
  }
  func.func @transform_6(%arg0: i32) -> (i32, i32) {
    %c0_i32 = arith.constant 0 : i32
    %c0_i32_0 = arith.constant 0 : i32
    %c0_i32_1 = arith.constant 0 : i32
    return %c0_i32, %c0_i32_0 : i32, i32
  }
  func.func @transform_7(%arg0: i32) -> (i32, i32) {
    %c0_i32 = arith.constant 0 : i32
    %c0_i32_0 = arith.constant 0 : i32
    %c0_i32_1 = arith.constant 0 : i32
    return %c0_i32, %c0_i32_0 : i32, i32
  }
  func.func @transform_8(%arg0: i32) -> (i32, i32) {
    %c0_i32 = arith.constant 0 : i32
    %c0_i32_0 = arith.constant 0 : i32
    %c0_i32_1 = arith.constant 0 : i32
    return %c0_i32, %c0_i32_0 : i32, i32
  }
  func.func @transform_9(%arg0: i32) -> (i32, i32) {
    %c0_i32 = arith.constant 0 : i32
    %c0_i32_0 = arith.constant 0 : i32
    %c0_i32_1 = arith.constant 0 : i32
    return %c0_i32, %c0_i32_0 : i32, i32
  }
  func.func @transform_10(%arg0: i32) -> (i32, i32) {
    %c0_i32 = arith.constant 0 : i32
    %c0_i32_0 = arith.constant 0 : i32
    %c0_i32_1 = arith.constant 0 : i32
    return %c0_i32, %c0_i32_0 : i32, i32
  }
  func.func @transform_11(%arg0: i32) -> (i32, i32) {
    %c0_i32 = arith.constant 0 : i32
    %c0_i32_0 = arith.constant 0 : i32
    %c0_i32_1 = arith.constant 0 : i32
    return %c0_i32, %c0_i32_0 : i32, i32
  }
  func.func @transform_12(%arg0: i32) -> (i32, i32) {
    %c0_i32 = arith.constant 0 : i32
    %c0_i32_0 = arith.constant 0 : i32
    %c0_i32_1 = arith.constant 0 : i32
    return %c0_i32, %c0_i32_0 : i32, i32
  }
  func.func @transform_13(%arg0: i32) -> (i32, i32) {
    %c0_i32 = arith.constant 0 : i32
    %c0_i32_0 = arith.constant 0 : i32
    %c0_i32_1 = arith.constant 0 : i32
    return %c0_i32, %c0_i32_0 : i32, i32
  }
  func.func @transform_14(%arg0: i32) -> (i32, i32) {
    %c0_i32 = arith.constant 0 : i32
    %c0_i32_0 = arith.constant 0 : i32
    %c0_i32_1 = arith.constant 0 : i32
    return %c0_i32, %c0_i32_0 : i32, i32
  }
  func.func @transform_15(%arg0: i32) -> (i32, i32) {
    %c0_i32 = arith.constant 0 : i32
    %c0_i32_0 = arith.constant 0 : i32
    %c0_i32_1 = arith.constant 0 : i32
    return %c0_i32, %c0_i32_0 : i32, i32
  }
  func.func @transform_16(%arg0: i32) -> (i32, i32) {
    %c0_i32 = arith.constant 0 : i32
    %c0_i32_0 = arith.constant 0 : i32
    %c0_i32_1 = arith.constant 0 : i32
    return %c0_i32, %c0_i32_0 : i32, i32
  }
  func.func @transform_17(%arg0: i32) -> (i32, i32) {
    %c0_i32 = arith.constant 0 : i32
    %c0_i32_0 = arith.constant 0 : i32
    %c0_i32_1 = arith.constant 0 : i32
    return %c0_i32, %c0_i32_0 : i32, i32
  }
  func.func @transform_18(%arg0: i32) -> (i32, i32) {
    %c0_i32 = arith.constant 0 : i32
    %c0_i32_0 = arith.constant 0 : i32
    %c0_i32_1 = arith.constant 0 : i32
    return %c0_i32, %c0_i32_0 : i32, i32
  }
  func.func @transform_19(%arg0: i32) -> (i32, i32) {
    %c0_i32 = arith.constant 0 : i32
    %c0_i32_0 = arith.constant 0 : i32
    %c0_i32_1 = arith.constant 0 : i32
    return %c0_i32, %c0_i32_0 : i32, i32
  }
  func.func @transform_20(%arg0: i32) -> (i32, i32) {
    %c0_i32 = arith.constant 0 : i32
    %c0_i32_0 = arith.constant 0 : i32
    %c0_i32_1 = arith.constant 0 : i32
    return %c0_i32, %c0_i32_0 : i32, i32
  }
  func.func @transform_21(%arg0: i32) -> (i32, i32) {
    %c0_i32 = arith.constant 0 : i32
    %c0_i32_0 = arith.constant 0 : i32
    %c0_i32_1 = arith.constant 0 : i32
    return %c0_i32, %c0_i32_0 : i32, i32
  }
  func.func @transform_22(%arg0: i32) -> (i32, i32, i32) {
    %c0_i32 = arith.constant 0 : i32
    %c0_i32_0 = arith.constant 0 : i32
    %c0_i32_1 = arith.constant 0 : i32
    return %arg0, %c0_i32, %c0_i32_0 : i32, i32, i32
  }
}

</mosaic_0001>

<bundles_post_ra>
// kernel: tpu_custom_call.1
= control target key start
LH: loop header
LB: loop body
LE: loop exit
PB: predicated region body
PF: predicated region fallthrough
CT: control target
= control target key end

     0   :  { %s5570_s0 = inlined_call_operand.hbm [shape: f32[2,8,32], index: 0, kind: input, shape index: {}]   ;;  %s5571_s1 = inlined_call_operand.hbm [shape: f32[2,8,32], index: 1, kind: input, shape index: {}]   ;;  %s5572_s2 = inlined_call_operand.hbm [shape: f32[2,8,8], index: 2, kind: input, shape index: {}]   ;;  %s5573_s3 = inlined_call_operand.vmem [shape: f32[2,1,8], index: 3, kind: input, shape index: {}]   ;;  %s5574_s4 = inlined_call_operand.vmem [shape: f32[32,32], index: 4, kind: input, shape index: {}]   ;;  %s5575_s5 = inlined_call_operand.vmem [shape: f32[32,32], index: 5, kind: input, shape index: {}]   ;;  %s5576_s6 = inlined_call_operand.vmem [shape: f32[32,32], index: 6, kind: input, shape index: {}]   ;;  %s5577_s7 = inlined_call_operand.hbm [shape: f32[32,32], index: 7, kind: input, shape index: {}]   ;;  %s5578_s8 = inlined_call_operand.hbm [shape: f32[32,32], index: 8, kind: input, shape index: {}]   ;;  %s5579_s9 = inlined_call_operand.hbm [shape: f32[32,32], index: 9, kind: input, shape index: {}]   ;;  %s5580_s10 = inlined_call_operand.hbm [shape: f32[32,32], index: 10, kind: input, shape index: {}]   ;;  %s5581_s11 = inlined_call_operand.hbm [shape: f32[32,32], index: 11, kind: input, shape index: {}]   ;;  %s5582_s12 = inlined_call_operand.hbm [shape: f32[32,64], index: 12, kind: input, shape index: {}]   ;;  %s5583_s13 = inlined_call_operand.vmem [shape: f32[1,64], index: 13, kind: input, shape index: {}]   ;;  %s5584_s14 = inlined_call_operand.vmem [shape: f32[64,32], index: 14, kind: input, shape index: {}]   ;;  %s5585_s15 = inlined_call_operand.vmem [shape: f32[1,32], index: 15, kind: input, shape index: {}]   ;;  %s5586_s16 = inlined_call_operand.vmem [shape: f32[1,32], index: 16, kind: input, shape index: {}]   ;;  %s5587_s17 = inlined_call_operand.vmem [shape: f32[1,32], index: 17, kind: input, shape index: {}]   ;;  %s5588_s18 = inlined_call_operand.vmem [shape: f32[1,32], index: 18, kind: input, shape index: {}]   ;;  %s5589_s19 = inlined_call_operand.vmem [shape: f32[1,32], index: 19, kind: input, shape index: {}]   ;;  %s5590_s20 = inlined_call_operand.vmem [shape: f32[1,32], index: 20, kind: input, shape index: {}]   ;;  %s5591_s21 = inlined_call_operand.vmem [shape: f32[1,32], index: 21, kind: input, shape index: {}]   ;;  %s5592_s22 = inlined_call_operand.hbm [shape: f32[2,8,32], index: 22, kind: output, shape index: {}]  }
   0x1   :  { %5626 = sst [smem:[#allocation30_spill]] %s5570_s0 }
   0x2   :  { %5627 = sst [smem:[#allocation31_spill]] %s5571_s1 }
   0x3   :  { %5628 = sst [smem:[#allocation32_spill]] %s5572_s2 }
   0x4   :  { %5629 = sst [smem:[#allocation33_spill]] %s5573_s3 }
   0x5   :  { %5630 = sst [smem:[#allocation34_spill]] %s5574_s4 }
   0x6   :  { %5631 = sst [smem:[#allocation35_spill]] %s5575_s5 }
   0x7   :  { %5632 = sst [smem:[#allocation36_spill]] %s5576_s6 }
   0x8   :  { %5633 = sst [smem:[#allocation37_spill]] %s5577_s7 }
   0x9   :  { %5634 = sst [smem:[#allocation38_spill]] %s5578_s8 }
   0xa   :  { %5635 = sst [smem:[#allocation39_spill]] %s5579_s9 }
   0xb   :  { %5636 = sst [smem:[#allocation40_spill]] %s5581_s11 }
   0xc   :  { %5637 = sst [smem:[#allocation41_spill]] %s5583_s13 }
   0xd   :  { %5638 = sst [smem:[#allocation42_spill]] %s5584_s14 }
   0xe   :  { %5639 = sst [smem:[#allocation43_spill]] %s5585_s15 }
   0xf   :  { %5640 = sst [smem:[#allocation44_spill]] %s5589_s19 }
  0x10   :  { %5641 = sst [smem:[#allocation45_spill]] %s5590_s20 }
  0x11   :  { %5642 = sst [smem:[#allocation46_spill]] %s5591_s21 }
  0x12   :  { %5643 = sst [smem:[#allocation47_spill]] %s5592_s22 }
  0x13   :  { %27 = vsyncpa [#allocation3], 0 }
  0x14   :  { %29 = vsyncpa [#allocation3 + $0x1], 0 }
  0x15   :  { %30 = vsyncpa [#allocation6], 0 }
  0x16   :  { %32 = vsyncpa [#allocation6 + $0x1], 0 }
  0x17   :  { %33 = vsyncpa [#allocation9], 0 }
  0x18   :  { %34 = vsyncpa [#allocation12], 0 }
  0x19   :  { %35 = vsyncpa [#allocation15], 0 }
  0x1a   :  { %36 = vsyncpa [#allocation4], 0 }
  0x1b   :  { %38 = vsyncpa [#allocation4 + $0x1], 0  ;;  %s4822_s3 = smov 0   ;;  %s4824_s28 = smov 0  }
  0x1c   :  { %s4826_s29 = smov 0   ;;  %s4828_s30 = smov 0  }
  0x1d LB: > { %5644 = sst [smem:[#allocation24_spill]] %s4674_s3  ;;  %s4688_s4 = smov [#allocation8]   ;;  %s4686_s30 = sphi %s4828_s30, %s5699_s30   ;;  %s4682_s29 = sphi %s4826_s29, %s5703_s29   ;;  %s4678_s28 = sphi %s4824_s28, %s5702_s28   ;;  %s4674_s3 = sphi %s4822_s3, %s5701_s3  }
  0x1e   : > { %5645 = sst [smem:[#allocation25_spill]] %s4686_s30  ;;  %s578_s0 = sshll.u32 %s4688_s4, 4  ;;  %s4848_s0 = int_to_ptr.vmem [resolvable:$true] %s578_s0 }
  0x1f   : > { %s4843_s23 = sadd.s32 4294967295, %s4686_s30   ;;  %p3737_p0 = scmp.ge.s32.totalorder %s4686_s30, 1 }
  0x20   : > { %p5610_p1 = scmp.eq.s32.totalorder %s4843_s23, 0  ;;  %p557_p2 = scmp.lt.s32.totalorder %s4686_s30, 3 }
  0x21   : > { %s4689_s5 = smov [#allocation11]   ;;  %s4690_s25 = smov [#allocation14]  }
  0x22   : > { %p4850_p3 = pnand %p3737_p0, %p557_p2  ;;  %s604_s24 = sshll.u32 %s4689_s5, 4  ;;  %s4863_s24 = int_to_ptr.vmem [resolvable:$true] %s604_s24 }
  0x23   : > { %s630_s26 = sshll.u32 %s4690_s25, 4  ;;  %s5648_s7 = sld [smem:[#allocation37_spill]]  ;;  %s4865_s26 = int_to_ptr.vmem [resolvable:$true] %s630_s26 }
  0x24   : > { %s5646_s1 = scalar_select %p4850_p3, 1, 0 }
  0x25   : > { %p4208_p5 = pneg %p4850_p3 }
  0x27   : > { %p4859_p6 = pnand %p4208_p5, %p5610_p1 }
  0x29   : > { %s5647_s6 = scalar_select %p4859_p6, 1, 0 }
  0x2a   : > { %s4346_s4 = scalar_lea.hbm %s5648_s7, 512  ;;  %p4875_p8 = pneg %p4859_p6 }
  0x2b   : > { %p4347_p7 = scmp.ne.s32.totalorder %s5648_s7, %s4346_s4  ;;  %p4353_p11 = scmp.lt.u32.totalorder %s4346_s4, %s5648_s7 }
  0x2c   : > { %s5649_s5 = scalar_select %p4875_p8, 1, 0 }
  0x2d   : > { %p4349_p9 = pnand %p4875_p8, %p4347_p7 }
  0x2f   : > { %p4350_p10 = pneg %p4349_p9 }
  0x31   : > { %p4355_p12 = pnand %p4353_p11, %p4350_p10 }
  0x33   : > { %4358 = shalt.err (!%p4355_p12)
}
  0x34   : > { %s4359_s15 = scalar_lea.vmem %s4848_s0, 512  ;;  %p4367_p5 = scmp.lt.s32.totalorder %s4848_s0, %s4848_s0 }
  0x35   : > { %p4360_p13 = scmp.ne.s32.totalorder %s4848_s0, %s4359_s15  ;;  %p4368_p4 = scmp.lt.s32.totalorder %s4359_s15, %s4359_s15 }
  0x37   : > { %p4362_p0 = pnand %p4360_p13, %p4875_p8  ;;  %p4369_p7 = por %p4368_p4, %p4367_p5 }
  0x39   : > { %p4363_p2 = pneg %p4362_p0 }
  0x3b   : > { %p4370_p9 = pnand %p4369_p7, %p4363_p2 }
  0x3d   : > { %4373 = shalt.err (!%p4370_p9)
}
  0x3e   : > { %s5602_s22 = smov 128   ;;  %s5604_s13 = smov 8  }
  0x3f   : > { %4211 = dma.hbm_to_vmem [thread:$0]  (!%p4859_p6), %s5648_s7, 512, %s4848_s0, [#allocation9], %s5602_s22, %s5602_s22, %s5604_s13  }
  0x40   : > { %s5650_s9 = sld [smem:[#allocation39_spill]] }
  0x46   : > { %s4374_s15 = scalar_lea.hbm %s5650_s9, 512 }
  0x47   : > { %p4375_p4 = scmp.ne.s32.totalorder %s5650_s9, %s4374_s15  ;;  %p4381_p12 = scmp.lt.u32.totalorder %s4374_s15, %s5650_s9 }
  0x49   : > { %p4377_p10 = pnand %p4375_p4, %p4875_p8 }
  0x4b   : > { %p4378_p11 = pneg %p4377_p10 }
  0x4d   : > { %p4383_p13 = pnand %p4381_p12, %p4378_p11 }
  0x4f   : > { %4386 = shalt.err (!%p4383_p13)
}
  0x50   : > { %s4387_s0 = scalar_lea.vmem %s4863_s24, 512  ;;  %p4395_p7 = scmp.lt.s32.totalorder %s4863_s24, %s4863_s24 }
  0x51   : > { %p4388_p0 = scmp.ne.s32.totalorder %s4863_s24, %s4387_s0  ;;  %p4396_p9 = scmp.lt.s32.totalorder %s4387_s0, %s4387_s0 }
  0x53   : > { %p4390_p2 = pnand %p4388_p0, %p4875_p8  ;;  %p4397_p4 = por %p4396_p9, %p4395_p7 }
  0x55   : > { %p4391_p5 = pneg %p4390_p2 }
  0x57   : > { %p4398_p10 = pnand %p4397_p4, %p4391_p5 }
  0x59   : > { %4401 = shalt.err (!%p4398_p10)
}
  0x5a   : > { %4217 = dma.hbm_to_vmem [thread:$0]  (!%p4859_p6), %s5650_s9, 512, %s4863_s24, [#allocation12], %s5602_s22, %s5602_s22, %s5604_s13  }
  0x5b   : > { %s5651_s11 = sld [smem:[#allocation40_spill]] }
  0x61   : > { %s4402_s2 = scalar_lea.hbm %s5651_s11, 512 }
  0x62   : > { %p4403_p11 = scmp.ne.s32.totalorder %s5651_s11, %s4402_s2  ;;  %p4409_p0 = scmp.lt.u32.totalorder %s4402_s2, %s5651_s11 }
  0x64   : > { %p4405_p12 = pnand %p4403_p11, %p4875_p8 }
  0x66   : > { %p4406_p13 = pneg %p4405_p12 }
  0x68   : > { %p4411_p2 = pnand %p4409_p0, %p4406_p13 }
  0x6a   : > { %4414 = shalt.err (!%p4411_p2)
}
  0x6b   : > { %s4415_s24 = scalar_lea.vmem %s4865_s26, 512  ;;  %p4423_p4 = scmp.lt.s32.totalorder %s4865_s26, %s4865_s26 }
  0x6c   : > { %p4416_p5 = scmp.ne.s32.totalorder %s4865_s26, %s4415_s24  ;;  %p4424_p10 = scmp.lt.s32.totalorder %s4415_s24, %s4415_s24 }
  0x6e   : > { %p4418_p7 = pnand %p4416_p5, %p4875_p8  ;;  %p4425_p11 = por %p4424_p10, %p4423_p4 }
  0x70   : > { %p4419_p9 = pneg %p4418_p7 }
  0x72   : > { %p4426_p12 = pnand %p4425_p11, %p4419_p9 }
  0x74   : > { %4429 = shalt.err (!%p4426_p12)
}
  0x75   : > { %4223 = dma.hbm_to_vmem [thread:$0]  (!%p4859_p6), %s5651_s11, 512, %s4865_s26, [#allocation15], %s5602_s22, %s5602_s22, %s5604_s13  }
  0x76   : > { %s3736_s19 = sadd.s32 4294967294, %s4686_s30   ;;  %s4953_s20 = sadd.s32 1, %s4686_s30  }
  0x77   : > { %5652 = sst [smem:[#allocation26_spill]] %s4953_s20  ;;  %s51_s21 = sadd.s32 1, %s4682_s29 }
  0x78   : > { %s48_s2 = ssub.s32 %s4686_s30, %s4953_s20  ;;  %p58_p13 = scmp.ne.s32.totalorder %s4682_s29, %s4678_s28 }
  0x79   : > { %p49_p0 = scmp.eq.s32.totalorder %s48_s2, 0  ;;  %p59_p2 = scmp.eq.s32.totalorder %s4686_s30, 0 }
  0x7a   : > { %p64_p5 = scmp.ne.s32.totalorder %s4678_s28, %s4674_s3  ;;  %p544_p7 = scmp.eq.s32.totalorder %s4843_s23, 1 }
  0x7b   : > { %s4965_s27 = scalar_select %p49_p0, %s4682_s29, %s51_s21  }
  0x7c   : > { %p60_p9 = por %p59_p2, %p58_p13  ;;  %p4969_p4 = por %p5610_p1, %p64_p5 }
  0x7d   : > { %5653 = sst [smem:[#allocation27_spill]] %s4965_s27  ;;  %p4973_p10 = por %p544_p7, %p58_p13 }
  0x7e   : > { %s5654_s26 = scalar_select %p4969_p4, 1, 0 }
  0x7f   : > { %s5655_s4 = scalar_select %p4973_p10, 1, 0 }
  0x80   : > { %p550_p11 = scmp.eq.s32.totalorder %s3736_s19, 1  ;;  %p4247_p12 = scmp.lt.s32.totalorder %s4686_s30, 2 }
  0x81   : > { %5656 = sst [smem:[#allocation28_spill]] %s5655_s4  ;;  %s5606_s25 = sand.u32 1, %s4682_s29  }
  0x82   : > { %p4979_p3 = por %p550_p11, %p64_p5  ;;  %s4985_s24 = sshll.u32 %s5606_s25, 3 }
  0x83   : > { %s4988_s0 = sshll.u32 %s4686_s30, 7  ;;  %p4990_p0 = pnand %p4247_p12, %p60_p9 }
  0x84   : > { %s5657_s15 = scalar_select %p4979_p3, 1, 0 }
  0x85   : > { %s5659_s14 = scalar_select %p4990_p0, 1, 0 }
  0x86   : > { %5658 = sst [smem:[#allocation29_spill]] %s5657_s15  ;;  %s702_s21 = sand.u32 1, %s4686_s30  }
  0x87   : > { %s5660_s22 = sld [smem:[#allocation31_spill]]  ;;  %s706_s25 = scalar_lea.vmem [#allocation5], %s4985_s24 }
  0x88   : > { %s713_s7 = sshll.u32 %s706_s25, 4  ;;  %s5004_s9 = scalar_lea.sflag [#allocation6], %s702_s21  ;;  %s5002_s7 = int_to_ptr.vmem [resolvable:$true] %s713_s7 }
  0x89   : > { %p5010_p2 = pneg %p4990_p0 }
  0x8b   : > { %s5661_s27 = scalar_select %p5010_p2, 1, 0 }
  0x8d   : > { %s4999_s13 = scalar_lea.hbm %s5660_s22, %s4988_s0  ;;  %s4435_s20 = scalar_lea.hbm %s5660_s22, 256 }
  0x8e   : > { %s4430_s11 = scalar_lea.hbm %s4999_s13, 128  ;;  %p4436_p9 = scmp.lt.u32.totalorder %s4999_s13, %s5660_s22 }
  0x8f   : > { %p4431_p13 = scmp.ne.s32.totalorder %s4999_s13, %s4430_s11  ;;  %p4437_p11 = scmp.lt.u32.totalorder %s4435_s20, %s4430_s11 }
  0x90   : > { %p4439_p1 = scmp.lt.u32.totalorder %s4430_s11, %s4999_s13 }
  0x91   : > { %p4433_p5 = pnand %p5010_p2, %p4431_p13  ;;  %p4438_p12 = por %p4437_p11, %p4436_p9 }
  0x93   : > { %p4434_p7 = pneg %p4433_p5  ;;  %p4440_p3 = por %p4439_p1, %p4438_p12 }
  0x95   : > { %p4441_p10 = pnand %p4440_p3, %p4434_p7 }
  0x97   : > { %4444 = shalt.err (!%p4441_p10)
}
  0x98   : > { %s4445_s21 = scalar_lea.vmem %s5002_s7, 128  ;;  %s4693_s19 = smov [#allocation5]  }
  0x99   : > { %p4446_p13 = scmp.ne.s32.totalorder %s5002_s7, %s4445_s21  ;;  %s4450_s2 = sshll.u32 %s4693_s19, 4  ;;  %s4451_s2 = int_to_ptr.vmem [resolvable:$false] %s4450_s2 }
  0x9a   : > { %s4452_s30 = scalar_lea.vmem %s4451_s2, 256  ;;  %p4453_p6 = scmp.lt.s32.totalorder %s5002_s7, %s4451_s2 }
  0x9b   : > { %p4448_p5 = pnand %p4446_p13, %p5010_p2  ;;  %p4454_p8 = scmp.lt.s32.totalorder %s4452_s30, %s4445_s21 }
  0x9d   : > { %p4449_p4 = pneg %p4448_p5  ;;  %p4455_p9 = por %p4454_p8, %p4453_p6 }
  0x9f   : > { %p4456_p11 = pnand %p4455_p9, %p4449_p4 }
  0xa1   : > { %4459 = shalt.err (!%p4456_p11)
}
  0xa2   : > { %4233 = dma.hbm_to_vmem [thread:$0]  (!%p4990_p0), %s4999_s13, 128, %s5002_s7, %s5004_s9  }
  0xa3   : > { %s4694_s11 = smov [#allocation10]   ;;  %s4695_s25 = smov [#allocation13]  }
  0xa4   : > { %s591_s20 = sshll.u32 %s4694_s11, 4  ;;  %s617_s22 = sshll.u32 %s4695_s25, 4  ;;  %s592_s20 = int_to_ptr.vmem [resolvable:$true] %s591_s20  ;;  %s618_s22 = int_to_ptr.vmem [resolvable:$true] %s617_s22 }
  0xa5   : > { %s5662_s8 = sld [smem:[#allocation38_spill]]  ;;  %p5663_p3 = scmp.ne.s32.totalorder %s5649_s5, 0 }
  0xab   : > { %s4460_s2 = scalar_lea.hbm %s5662_s8, 512 }
  0xac   : > { %p4461_p1 = scmp.ne.s32.totalorder %s5662_s8, %s4460_s2  ;;  %p4467_p4 = scmp.lt.u32.totalorder %s4460_s2, %s5662_s8 }
  0xae   : > { %p4463_p6 = pnand %p4461_p1, %p5663_p3 }
  0xb0   : > { %p4464_p8 = pneg %p4463_p6 }
  0xb2   : > { %p4469_p10 = pnand %p4467_p4, %p4464_p8 }
  0xb4   : > { %4472 = shalt.err (!%p4469_p10)
}
  0xb5   : > { %s4473_s7 = scalar_lea.vmem %s592_s20, 512  ;;  %p4481_p5 = scmp.lt.s32.totalorder %s592_s20, %s592_s20 }
  0xb6   : > { %p4474_p7 = scmp.ne.s32.totalorder %s592_s20, %s4473_s7  ;;  %p4482_p9 = scmp.lt.s32.totalorder %s4473_s7, %s4473_s7 }
  0xb8   : > { %p4476_p12 = pnand %p4474_p7, %p5663_p3  ;;  %p4483_p11 = por %p4482_p9, %p4481_p5 }
  0xba   : > { %p4477_p13 = pneg %p4476_p12 }
  0xbc   : > { %p4484_p0 = pnand %p4483_p11, %p4477_p13 }
  0xbe   : > { %4487 = shalt.err (!%p4484_p0)
}
  0xbf   : > { %p5664_p1 = scmp.ne.s32.totalorder %s5647_s6, 0  ;;  %s5665_s13 = smov 8  }
  0xc0   : > { %s5666_s15 = smov 128   ;;  %s4488_s19 = scalar_lea.hbm %s5580_s10, 512 }
  0xc1   : > { %4214 = dma.hbm_to_vmem [thread:$0]  (!%p5664_p1), %s5662_s8, 512, %s592_s20, [#allocation9], %s5666_s15, %s5666_s15, %s5665_s13  }
  0xc2   : > { %p4489_p6 = scmp.ne.s32.totalorder %s5580_s10, %s4488_s19  ;;  %p4495_p4 = scmp.lt.u32.totalorder %s4488_s19, %s5580_s10 }
  0xc4   : > { %p4491_p0 = pnand %p4489_p6, %p5663_p3 }
  0xc6   : > { %p4492_p8 = pneg %p4491_p0 }
  0xc8   : > { %p4497_p10 = pnand %p4495_p4, %p4492_p8 }
  0xca   : > { %4500 = shalt.err (!%p4497_p10)
}
  0xcb   : > { %s4501_s3 = scalar_lea.vmem %s618_s22, 512  ;;  %p4509_p5 = scmp.lt.s32.totalorder %s618_s22, %s618_s22 }
  0xcc   : > { %p4502_p7 = scmp.ne.s32.totalorder %s618_s22, %s4501_s3  ;;  %p4510_p9 = scmp.lt.s32.totalorder %s4501_s3, %s4501_s3 }
  0xce   : > { %p4504_p12 = pnand %p4502_p7, %p5663_p3  ;;  %p4511_p11 = por %p4510_p9, %p4509_p5 }
  0xd0   : > { %p4505_p13 = pneg %p4504_p12 }
  0xd2   : > { %p4512_p2 = pnand %p4511_p11, %p4505_p13 }
  0xd4   : > { %4515 = shalt.err (!%p4512_p2)
}
  0xd5   : > { %4220 = dma.hbm_to_vmem [thread:$0]  (!%p5664_p1), %s5580_s10, 512, %s618_s22, [#allocation12], %s5666_s15, %s5666_s15, %s5665_s13  }
  0xd6   : > { %s4696_s11 = smov [#allocation16]   ;;  %s4516_s21 = scalar_lea.hbm %s5582_s12, 512 }
  0xd7   : > { %s643_s25 = sshll.u32 %s4696_s11, 4  ;;  %p4517_p2 = scmp.ne.s32.totalorder %s5582_s12, %s4516_s21  ;;  %s644_s25 = int_to_ptr.vmem [resolvable:$true] %s643_s25 }
  0xd8   : > { %p4523_p8 = scmp.lt.u32.totalorder %s4516_s21, %s5582_s12 }
  0xd9   : > { %p4519_p6 = pnand %p4517_p2, %p5663_p3 }
  0xdb   : > { %p4520_p0 = pneg %p4519_p6 }
  0xdd   : > { %p4525_p4 = pnand %p4523_p8, %p4520_p0 }
  0xdf   : > { %4528 = shalt.err (!%p4525_p4)
}
  0xe0   : > { %s4529_s22 = scalar_lea.vmem %s644_s25, 512  ;;  %p4537_p13 = scmp.lt.s32.totalorder %s644_s25, %s644_s25 }
  0xe1   : > { %p4530_p10 = scmp.ne.s32.totalorder %s644_s25, %s4529_s22  ;;  %p4538_p5 = scmp.lt.s32.totalorder %s4529_s22, %s4529_s22 }
  0xe3   : > { %p4532_p7 = pnand %p4530_p10, %p5663_p3  ;;  %p4539_p9 = por %p4538_p5, %p4537_p13 }
  0xe5   : > { %p4533_p12 = pneg %p4532_p7 }
  0xe7   : > { %p4540_p11 = pnand %p4539_p9, %p4533_p12 }
  0xe9   : > { %4543 = shalt.err (!%p4540_p11)
}
  0xea   : > { %4226 = dma.hbm_to_vmem [thread:$0]  (!%p5664_p1), %s5582_s12, 512, %s644_s25, [#allocation15], %s5666_s15, %s5666_s15, %s5665_s13  }
  0xeb   : > { %s5667_s11 = sld [smem:[#allocation30_spill]]  ;;  %s688_s6 = scalar_lea.vmem [#allocation2], %s4985_s24 }
  0xec   : > { %s695_s2 = sshll.u32 %s688_s6, 4  ;;  %s5668_s21 = sand.u32 1, %s4682_s29   ;;  %s696_s2 = int_to_ptr.vmem [resolvable:$true] %s695_s2 }
  0xed   : > { %s685_s30 = scalar_lea.sflag [#allocation3], %s5668_s21  ;;  %p5669_p2 = scmp.ne.s32.totalorder %s5661_s27, 0 }
  0xf1   : > { %s5101_s19 = scalar_lea.hbm %s5667_s11, %s4988_s0  ;;  %s4549_s25 = scalar_lea.hbm %s5667_s11, 256 }
  0xf2   : > { %s4544_s7 = scalar_lea.hbm %s5101_s19, 128  ;;  %p4550_p1 = scmp.lt.u32.totalorder %s5101_s19, %s5667_s11 }
  0xf3   : > { %p4545_p3 = scmp.ne.s32.totalorder %s5101_s19, %s4544_s7  ;;  %p4551_p8 = scmp.lt.u32.totalorder %s4549_s25, %s4544_s7 }
  0xf4   : > { %p4553_p10 = scmp.lt.u32.totalorder %s4544_s7, %s5101_s19 }
  0xf5   : > { %p4547_p6 = pnand %p4545_p3, %p5669_p2  ;;  %p4552_p4 = por %p4551_p8, %p4550_p1 }
  0xf7   : > { %p4548_p0 = pneg %p4547_p6  ;;  %p4554_p7 = por %p4553_p10, %p4552_p4 }
  0xf9   : > { %p4555_p12 = pnand %p4554_p7, %p4548_p0 }
  0xfb   : > { %4558 = shalt.err (!%p4555_p12)
}
  0xfc   : > { %s4559_s8 = scalar_lea.vmem %s696_s2, 128  ;;  %s4697_s20 = smov [#allocation2]  }
  0xfd   : > { %p4560_p13 = scmp.ne.s32.totalorder %s696_s2, %s4559_s8  ;;  %s4564_s5 = sshll.u32 %s4697_s20, 4  ;;  %s4565_s5 = int_to_ptr.vmem [resolvable:$false] %s4564_s5 }
  0xfe   : > { %s4566_s4 = scalar_lea.vmem %s4565_s5, 256  ;;  %p4567_p11 = scmp.lt.s32.totalorder %s696_s2, %s4565_s5 }
  0xff   : > { %p4562_p5 = pnand %p4560_p13, %p5669_p2  ;;  %p4568_p3 = scmp.lt.s32.totalorder %s4566_s4, %s4559_s8 }
 0x101   : > { %p4563_p9 = pneg %p4562_p5  ;;  %p4569_p6 = por %p4568_p3, %p4567_p11 }
 0x103   : > { %p4570_p1 = pnand %p4569_p6, %p4563_p9 }
 0x105   : > { %4573 = shalt.err (!%p4570_p1)
}
 0x106   : > { %p5670_p8 = scmp.ne.s32.totalorder %s5659_s14, 0  ;;  %s5671_s7 = sld [smem:[#allocation32_spill]] }
 0x107   : > { %s724_s15 = scalar_lea.vmem [#allocation7], %s4985_s24 }
 0x108   : > { %4230 = dma.hbm_to_vmem [thread:$0]  (!%p5670_p8), %s5101_s19, 128, %s696_s2, %s685_s30  }
 0x109   : > { %s731_s25 = sshll.u32 %s724_s15, 4  ;;  %s732_s25 = int_to_ptr.vmem [resolvable:$true] %s731_s25 }
 0x10c   : > { %s5127_s13 = scalar_lea.hbm %s5671_s7, %s4988_s0  ;;  %s4579_s19 = scalar_lea.hbm %s5671_s7, 256 }
 0x10d   : > { %s4574_s3 = scalar_lea.hbm %s5127_s13, 128  ;;  %p4580_p7 = scmp.lt.u32.totalorder %s5127_s13, %s5671_s7 }
 0x10e   : > { %p4575_p0 = scmp.ne.s32.totalorder %s5127_s13, %s4574_s3  ;;  %p4581_p12 = scmp.lt.u32.totalorder %s4579_s19, %s4574_s3 }
 0x10f   : > { %p4583_p5 = scmp.lt.u32.totalorder %s4574_s3, %s5127_s13 }
 0x110   : > { %p4577_p4 = pnand %p4575_p0, %p5669_p2  ;;  %p4582_p13 = por %p4581_p12, %p4580_p7 }
 0x112   : > { %p4578_p10 = pneg %p4577_p4  ;;  %p4584_p9 = por %p4583_p5, %p4582_p13 }
 0x114   : > { %p4585_p11 = pnand %p4584_p9, %p4578_p10 }
 0x116   : > { %4588 = shalt.err (!%p4585_p11)
}
 0x117   : > { %s4589_s24 = scalar_lea.vmem %s732_s25, 128  ;;  %s4698_s0 = smov [#allocation7]  }
 0x118   : > { %p4590_p3 = scmp.ne.s32.totalorder %s732_s25, %s4589_s24  ;;  %s4594_s20 = sshll.u32 %s4698_s0, 4  ;;  %s4595_s20 = int_to_ptr.vmem [resolvable:$false] %s4594_s20 }
 0x119   : > { %s4596_s5 = scalar_lea.vmem %s4595_s20, 256  ;;  %p4597_p0 = scmp.lt.s32.totalorder %s732_s25, %s4595_s20 }
 0x11a   : > { %p4592_p6 = pnand %p4590_p3, %p5669_p2  ;;  %p4598_p4 = scmp.lt.s32.totalorder %s4596_s5, %s4589_s24 }
 0x11c   : > { %p4593_p1 = pneg %p4592_p6  ;;  %p4599_p8 = por %p4598_p4, %p4597_p0 }
 0x11e   : > { %p4600_p7 = pnand %p4599_p8, %p4593_p1 }
 0x120   : > { %4603 = shalt.err (!%p4600_p7)
}
 0x121   : > { %p5672_p12 = scmp.ne.s32.totalorder %s5659_s14, 0  ;;  %p5673_p10 = scmp.ne.s32.totalorder %s5646_s1, 0 }
 0x122   : > { %s5151_s27 = sand.u32 (!%p5673_p10), 1, %s4678_s28   ;;  %p5674_p2 = scmp.ne.s32.totalorder (!%p5673_p10), %s5654_s26, 0 }
 0x123   : > { %4236 = dma.hbm_to_vmem [thread:$0]  (!%p5672_p12), %s5127_s13, 128, %s732_s25, %s5004_s9  }
 0x124   : > { %746 = sbr.rel (%p5673_p10) target bundleno = 5927 (0x1727), region = 108  ;;  %s5154_s4 = sshll.u32 (!%p5673_p10), %s5151_s27, 3 }
 0x125   : > { %s749_s6 = scalar_lea.sflag (!%p5673_p10), [#allocation3], %s5151_s27  ;;  %s752_s21 = scalar_lea.vmem (!%p5673_p10), [#allocation2], %s5154_s4 }
 0x12b   : > { %4649 = dma.done.wait (%p5674_p2), %s749_s6, 128  }
 0x12c   : > { %4651 = vsyncadd (%p5674_p2), %s749_s6, 4294967168  ;;  %s757_s9 = sand.u32 1, %s4843_s23   ;;  %s761_s14 = scalar_lea.vmem [#allocation5], %s5154_s4 }
 0x12d   : > { %s758_s1 = scalar_lea.sflag [#allocation6], %s757_s9 }
 0x12e   : > { %4653 = dma.done.wait (%p5674_p2), %s758_s1, 256  }
 0x12f   : > { %4655 = vsyncadd (%p5674_p2), %s758_s1, 4294967040  ;;  %s770_s13 = scalar_lea.vmem [#allocation7], %s5154_s4  ;;  %p5675_p8 = scmp.eq.s32.totalorder %s4843_s23, 0 }
 0x131   : > { %4657 = dma.done.wait (%p5675_p8), [#allocation9], 1024   ;;  %p5676_p13 = pmov %p5675_p8 }
 0x132   : > { %p5677_p5 = pmov %p5675_p8 }
 0x133   : > { %4659 = vsyncadd (%p5676_p13), [#allocation9], 4294966272 }
 0x134   : > { %4661 = dma.done.wait (%p5677_p5), [#allocation12], 1024   ;;  %p5678_p9 = pmov %p5677_p5 }
 0x135   : > { %p5679_p11 = pmov %p5677_p5 }
 0x136   : > { %4663 = vsyncadd (%p5678_p9), [#allocation12], 4294966272 }
 0x137   : > { %4665 = dma.done.wait (%p5679_p11), [#allocation15], 1024   ;;  %p5680_p3 = pmov %p5677_p5 }
 0x138   : > { %vm877_vm0 = vcmask 261120   ;;  %v5181_v0 = vld [vmem:[%s752_s21] sm:$0xff]  ;;  %s5681_s25 = sld [smem:[#allocation34_spill]]  ;;  %s5682_s2 = sld [smem:[#allocation35_spill]]  ;;  %v4699_v10 = vmov 0.0|0.0   ;;  %vm4700_vm1 = vmmov 0  }
 0x139   : > { %4667 = vsyncadd (%p5680_p3), [#allocation15], 4294966272  ;;  %v878_v1 = vsel %vm877_vm0, %v5181_v0, 0.0  ;;  %4122 = vmatprep.subr.bf16.mxu0 %v4699_v10  ;;  %4128 = vmatprep.subr.bf16.mxu1 %v4699_v10  ;;  %v4701_v18 = vmov 0.0   ;;  %v3762_v29 = vld [vmem:[%s5586_s16] ss:$0 sm:$0xff] }
 0x13a   : > { %879 = vadd.xlane.f32.xlu0 %v878_v1  ;;  %3914 = vmatprep.mubr.msk.f32.mxu0 %vm4700_vm1, %v4701_v18  ;;  %s5683_s19 = sld [smem:[#allocation36_spill]]  ;;  %v3763_v34 = vld [vmem:[%s5587_s17] ss:$0 sm:$0xff]  ;;  %vm1144_vm4 = vcmask 64512   ;;  %s4702_s1 = smov 120   ;;  %vm3467_vm12 = vcmask 523264  }
 0x13b   : > { %3925 = vmatprep.mubr.msk.f32.mxu1 %vm4700_vm1, %v4701_v18  ;;  %v5272_v50 = vld [vmem:[%s770_s13] sm:$0xff]  ;;  %s4703_s13 = smov 112   ;;  %s4704_s26 = smov 104  }
 0x13c   : > { %vm1143_vm5 = vcmp.eq.f32.partialorder %v5272_v50, 0.0  ;;  %s5684_s8 = sld [smem:[#allocation44_spill]]  ;;  %p868_p6 = scmp.lt.s32.totalorder %s4843_s23, 1 }
 0x13d   : > { %s5685_s20 = sld [smem:[#allocation33_spill]]  ;;  %s5686_s9 = sld [smem:[#allocation42_spill]] }
 0x13e   : > { %v913_v7 = vld [vmem:[%s5681_s25] sm:$0xff]  ;;  %v914_v8 = vld [vmem:[%s5681_s25 + $0x8] sm:$0xff]  ;;  %v915_v13 = vld [vmem:[%s5681_s25 + $0x10] sm:$0xff]  ;;  %s869_s30 = scalar_select %p868_p6, %s4843_s23, 1 }
 0x13f   : > { %v917_v9 = vld [vmem:[%s5682_s2] sm:$0xff]  ;;  %v4123_v11 = vpack.c.bf16 %v914_v8, %v913_v7  ;;  %v918_v12 = vld [vmem:[%s5682_s2 + $0x8] sm:$0xff]  ;;  %v916_v14 = vld [vmem:[%s5681_s25 + $0x18] sm:$0xff]  ;;  %s867_s6 = scalar_lea.vmem [#allocation17], %s5154_s4  ;;  %s3544_s15 = scalar_lea.sflag [#allocation4], %s5151_s27 }
 0x140   : > { %v4129_v15 = vpack.c.bf16 %v918_v12, %v917_v9  ;;  %v919_v16 = vld [vmem:[%s5682_s2 + $0x10] sm:$0xff]  ;;  %v920_v17 = vld [vmem:[%s5682_s2 + $0x18] sm:$0xff]  ;;  %v4126_v19 = vpack.c.bf16 %v916_v14, %v915_v13  ;;  %v921_v31 = vld [vmem:[%s5683_s19] sm:$0xff]  ;;  %s3557_s21 = sshll.u32 %s867_s6, 4  ;;  %s4706_s4 = smov [#allocation17]   ;;  %s5527_s21 = int_to_ptr.vmem [resolvable:$true] %s3557_s21 }
 0x141   : > { %4124 = vmatpush3.bf16.msra.mxu0 %v4123_v11  ;;  %v4132_v20 = vpack.c.bf16 %v920_v17, %v919_v16  ;;  %v922_v32 = vld [vmem:[%s5683_s19 + $0x8] sm:$0xff]  ;;  %v923_v38 = vld [vmem:[%s5683_s19 + $0x10] sm:$0xff]  ;;  %v924_v39 = vld [vmem:[%s5683_s19 + $0x18] sm:$0xff]  ;;  %s4608_s3 = sshll.u32 %s4706_s4, 4  ;;  %s4609_s3 = int_to_ptr.vmem [resolvable:$false] %s4608_s3 }
 0x142   : > { %4130 = vmatpush3.bf16.msra.mxu1 %v4129_v15  ;;  %4125 = vmatprep.subr.bf16.mxu0 %v4699_v10  ;;  %v4135_v36 = vpack.c.bf16 %v922_v32, %v921_v31  ;;  %v4138_v40 = vpack.c.bf16 %v924_v39, %v923_v38  ;;  %v925_v7 = vld [vmem:[#allocation8] sm:$0xff]  ;;  %v926_v8 = vld [vmem:[#allocation8 + $0x8] sm:$0xff]  ;;  %s4610_s22 = scalar_lea.vmem %s4609_s3, 256  ;;  %p4611_p12 = scmp.lt.s32.totalorder %s5527_s21, %s4609_s3 }
 0x143   : > { %4131 = vmatprep.subr.bf16.mxu1 %v4699_v10  ;;  %s870_s5 = scalar_lea.vmem %s5685_s20, %s869_s30  ;;  %s5690_s30 = sld [smem:[#allocation28_spill]] }
 0x144   : > { %s5691_s20 = sld [smem:[#allocation43_spill]] }
 0x145   : > { %4127 = vmatpush3.bf16.msra.mxu0 %v4126_v19 }
 0x146   : > { %4133 = vmatpush3.bf16.msra.mxu1 %v4132_v20  ;;  %4134 = vmatprep.subr.bf16.mxu0 %v4699_v10 }
 0x147   : > { %3944 = vmatprep.subr.mxu1 %v4701_v18 }
 0x149   : > { %p5693_p0 = scmp.ne.s32.totalorder %s5690_s30, 0 }
 0x1c7   : > { %v880_v2 = vpop.xlane.xlu0 %879 }
 0x1c8   : > { %v882_v3 = vmul.f32 0.03125, %v880_v2 }
 0x1ca   : > { %v883_v4 = vsub.f32 %v5181_v0, %v882_v3 }
 0x1cc   : > { %v884_v5 = vmul.f32 %v883_v4, %v883_v4  ;;  %v904_v30 = vmul.f32 %v3762_v29, %v883_v4 }
 0x1ce   : > { %v885_v6 = vsel %vm877_vm0, %v884_v5, 0.0 }
 0x1cf   : > { %886 = vadd.xlane.f32.xlu0 %v885_v6 }
 0x25c   : > { %v887_v21 = vpop.xlane.xlu0 %886 }
 0x25d   : > { %v888_v22 = vmul.f32 0.032258064, %v887_v21 }
 0x25f   : > { %4302 = vrsqrt.f32 %v888_v22  ;;  %vm891_vm2 = vcmp.eq.f32.partialorder %v888_v22, inf  ;;  %v894_v25 = vand.u32 2147483648, %v888_v22  ;;  %vm893_vm3 = vcmp.eq.f32.partialorder %v888_v22, 0.0 }
 0x269   : > { %v4303_v23 = vpop.eup %4302 }
 0x26a   : > { %v890_v24 = vmul.f32 %v4303_v23, %v888_v22 }
 0x26c   : > { %v892_v26 = vsel %vm891_vm2, %v888_v22, %v890_v24 }
 0x26d   : > { %v895_v27 = vsel %vm893_vm3, %v894_v25, %v892_v26 }
 0x26e   : > { %v896_v28 = vadd.f32 1e-06, %v895_v27 }
 0x270   : > { %4304 = vrcp.f32 %v896_v28 }
 0x27a   : > { %v4305_v33 = vpop.eup %4304 }
 0x27b   : > { %v905_v35 = vmul.f32 %v4305_v33, %v904_v30 }
 0x27d   : > { %v912_v37 = vadd.f32 %v3763_v34, %v905_v35 }
 0x27f   : > { %3915 = vmatmul.mubr.msk.f32.vlgmr.msra.gmra.mrb[0].mxu0 %vm877_vm0, %v912_v37  ;;  %3926 = vmatmul.mubr.msk.f32.vlgmr.msra.gmra.mrb[0].mxu1 %vm877_vm0, %v912_v37 }
 0x280   : > { %4136 = vmatpush3.bf16.msra.mxu0 %v4135_v36  ;;  %3936 = vmatprep.mubr.msk.f32.mxu0 %vm4700_vm1, %v4701_v18 }
 0x281   : > { %4137 = vmatprep.subr.bf16.mxu0 %v4699_v10  ;;  %3946 = vmatprep.mubr.msk.f32.mxu1 %vm4700_vm1, %v4701_v18 }
 0x284   : > { %4139 = vmatpush3.bf16.msra.mxu0 %v4138_v40  ;;  %v927_v40 = vld [vmem:[#allocation8 + $0x10] sm:$0xff] }
 0x285   : > { %3939 = vmatprep.subr.mxu0 %v4701_v18 }
 0x287   : > { %3937 = vmatmul.mubr.msk.f32.vlgmr.msra.gmra.mrb[2].mxu0 %vm877_vm0, %v912_v37 }
 0x288   : > { %3941 = vmatprep.mubr.msk.f32.mxu0 %vm4700_vm1, %v4701_v18 }
 0x352   : > { %v998_v41 = vpop.f32.mrb[0].mxu0  ;;  %v1069_v42 = vpop.f32.mrb[0].mxu1 }
 0x353   : > { %v5250_v43 = vmul.f32 0.35355338, %v998_v41  ;;  %1308 = vrot.lane.b32.xlu1 %v1069_v42, %s4702_s1  ;;  %v3916_v44 = vpop.f32.mrb[1].mxu0  ;;  %v3927_v45 = vpop.f32.mrb[1].mxu1  ;;  %3940 = vmatpush3.xpose.msk.msra.mxu0 %vm1144_vm4, %v1069_v42 }
 0x354   : > { %3949 = vmatprep.subr.mxu0 %v4701_v18 }
 0x356   : > { %3942 = vmatmul.mubr.msk.f32.vlgmr.msra.gmra.mrb[4].mxu0 %vm1144_vm4, %v5250_v43 }
 0x357   : > { %1306 = vrot.lane.b32.xlu1 %v5250_v43, %s4702_s1  ;;  %3951 = vmatprep.mubr.msk.f32.mxu0 %vm4700_vm1, %v4701_v18 }
 0x35a   : > { %v5261_v46 = vpop.f32.mrb[2].mxu0 }
 0x35b   : > { %v3938_v47 = vpop.f32.mrb[3].mxu0  ;;  %3945 = vmatpush3.msra.mxu1 %v5261_v46 }
 0x35c   : > { %3954 = vmatprep.subr.mxu1 %v4701_v18 }
 0x3c5   : > { %v1309_v48 = vpop.permute.xlu1 %1308 }
 0x3c6   : > { %3950 = vmatpush3.xpose.msk.msra.mxu0 %vm1144_vm4, %v1309_v48 }
 0x3c7   : > { %3959 = vmatprep.subr.mxu0 %v4701_v18 }
 0x3c9   : > { %v1307_v49 = vpop.permute.xlu1 %1306 }
 0x3ca   : > { %3952 = vmatmul.mubr.msk.f32.vlgmr.msra.gmra.mrb[6].mxu0 %vm1144_vm4, %v1307_v49 }
 0x3cb   : > { %3961 = vmatprep.mubr.msk.f32.mxu0 %vm4700_vm1, %v4701_v18  ;;  %3960 = vmatpush3.msra.mxu0 %v926_v8 }
 0x3cc   : > { %3969 = vmatprep.subr.mxu0 %v4701_v18 }
 0x429   : > { %v1217_v51 = vpop.f32.mrb[4].mxu0 }
 0x42a   : > { %v1221_v52 = vsel %vm1143_vm5, -1e+09, %v1217_v51  ;;  %v3943_v53 = vpop.f32.mrb[5].mxu0 }
 0x42b   : > { %v1222_v54 = vsel %vm1144_vm4, %v1221_v52, -inf }
 0x42c   : > { %1223 = vmax.xlane.f32.xlu0 %v1222_v54 }
 0x442   : > { %1396 = vrot.lane.b32.xlu0 %v5261_v46, %s4702_s1 }
 0x49d   : > { %v1380_v55 = vpop.f32.mrb[6].mxu0 }
 0x49e   : > { %v1384_v56 = vsel %vm1143_vm5, -1e+09, %v1380_v55  ;;  %v3953_v57 = vpop.f32.mrb[7].mxu0 }
 0x49f   : > { %v1385_v58 = vsel %vm1144_vm4, %v1384_v56, -inf  ;;  %v928_v57 = vld [vmem:[#allocation8 + $0x18] sm:$0xff] }
 0x4a0   : > { %1386 = vmax.xlane.f32.xlu1 %v1385_v58 }
 0x4b1   : > { %1621 = vrot.lane.b32.xlu1 %v1069_v42, %s4703_s13 }
 0x4b5   : > { %1619 = vrot.lane.b32.xlu1 %v5250_v43, %s4703_s13 }
 0x4b9   : > { %v1224_v59 = vpop.xlane.xlu0 %1223 }
 0x4ba   : > { %v1225_v60 = vsub.f32 %v1221_v52, %v1224_v59 }
 0x4bc   : > { %v1226_v61 = vmul.f32 1.442695, %v1225_v60 }
 0x4bd   : > { %v1397_v63 = vpop.permute.xlu0 %1396 }
 0x4be   : > { %4306 = vpow2.f32 %v1226_v61 }
 0x4c8   : > { %v4307_v62 = vpop.eup %4306 }
 0x4c9   : > { %3947 = vmatmul.mubr.msk.f32.vlgmr.msra.gmra.mrb[2].mxu1 %vm1144_vm4, %v4307_v62  ;;  %v1228_v6 = vsel %vm1144_vm4, %v4307_v62, 0.0 }
 0x4ca   : > { %3955 = vmatpush3.msra.mxu1 %v1397_v63  ;;  %3956 = vmatprep.mubr.msk.f32.mxu1 %vm4700_vm1, %v4701_v18 }
 0x4cb   : > { %3964 = vmatprep.subr.mxu1 %v4701_v18 }
 0x52d   : > { %v1387_v1 = vpop.xlane.xlu1 %1386 }
 0x52e   : > { %v1388_v2 = vsub.f32 %v1384_v56, %v1387_v1 }
 0x530   : > { %v1389_v3 = vmul.f32 1.442695, %v1388_v2 }
 0x531   : > { %v1622_v19 = vpop.permute.xlu1 %1621 }
 0x532   : > { %4308 = vpow2.f32 %v1389_v3 }
 0x535   : > { %v1620_v23 = vpop.permute.xlu1 %1619 }
 0x53c   : > { %v4309_v4 = vpop.eup %4308 }
 0x53d   : > { %3957 = vmatmul.mubr.msk.f32.vlgmr.msra.gmra.mrb[4].mxu1 %vm1144_vm4, %v4309_v4  ;;  %v1391_v5 = vsel %vm1144_vm4, %v4309_v4, 0.0 }
 0x53e   : > { %1392 = vadd.xlane.f32.xlu0 %v1391_v5  ;;  %3966 = vmatprep.mubr.msk.f32.mxu1 %vm4700_vm1, %v4701_v18 }
 0x53f   : > { %3965 = vmatpush3.msra.mxu1 %v925_v7 }
 0x540   : > { %3974 = vmatprep.subr.mxu1 %v4701_v18 }
 0x542   : > { %1229 = vadd.xlane.f32.xlu0 %v1228_v6 }
 0x558   : > { %1708 = vrot.lane.b32.xlu0 %v5261_v46, %s4703_s13 }
 0x55c   : > { %1861 = vrot.lane.b32.xlu0 %v1069_v42, %s4704_s26 }
 0x560   : > { %1859 = vrot.lane.b32.xlu0 %v5250_v43, %s4704_s26 }
 0x59c   : > { %v1301_v9 = vpop.f32.mrb[2].mxu1 }
 0x59d   : > { %v3948_v11 = vpop.f32.mrb[3].mxu1 }
 0x5cb   : > { %v1393_v12 = vpop.xlane.xlu0 %1392 }
 0x5cf   : > { %v1230_v13 = vpop.xlane.xlu0 %1229 }
 0x5d0   : > { %4310 = vrcp.f32 %v1230_v13  ;;  %v2140_v13 = vld [vmem:[#allocation11] sm:$0xff] }
 0x5d1   : > { %4312 = vrcp.f32 %v1393_v12 }
 0x5d3   : > { %v1709_v16 = vpop.permute.xlu0 %1708 }
 0x5d7   : > { %v1862_v36 = vpop.permute.xlu0 %1861 }
 0x5da   : > { %v4311_v14 = vpop.eup %4310 }
 0x5db   : > { %v1305_v15 = vmul.f32 %v4311_v14, %v1301_v9  ;;  %v4313_v17 = vpop.eup %4312  ;;  %v1860_v39 = vpop.permute.xlu0 %1859  ;;  %v2141_v14 = vld [vmem:[#allocation11 + $0x8] sm:$0xff] }
 0x5dd   : > { %3967 = vmatmul.mubr.msk.f32.vlgmr.msra.gmra.mrb[6].mxu1 %vm1144_vm4, %v1305_v15  ;;  %v2136_v15 = vld [vmem:[#allocation10] sm:$0xff] }
 0x5de   : > { %3975 = vmatpush3.msra.mxu1 %v1709_v16  ;;  %3976 = vmatprep.mubr.msk.f32.mxu1 %vm4700_vm1, %v4701_v18  ;;  %v4147_v16 = vpack.c.bf16 %v2141_v14, %v2140_v13 }
 0x5df   : > { %3984 = vmatprep.subr.mxu1 %v4701_v18 }
 0x610   : > { %v1468_v20 = vpop.f32.mrb[4].mxu1 }
 0x611   : > { %v1472_v21 = vmul.f32 %v4313_v17, %v1468_v20  ;;  %v3958_v22 = vpop.f32.mrb[5].mxu1  ;;  %v2137_v17 = vld [vmem:[#allocation10 + $0x8] sm:$0xff] }
 0x612   : > { %v4141_v20 = vpack.c.bf16 %v2137_v17, %v2136_v15  ;;  %v2139_v22 = vld [vmem:[#allocation10 + $0x18] sm:$0xff] }
 0x613   : > { %3962 = vmatmul.mubr.msk.f32.vlgmr.msra.gmra.mrb[8].mxu0 %vm1144_vm4, %v1472_v21  ;;  %v2138_v21 = vld [vmem:[#allocation10 + $0x10] sm:$0xff] }
 0x614   : > { %3970 = vmatpush3.xpose.msk.msra.mxu0 %vm1144_vm4, %v1622_v19  ;;  %3971 = vmatprep.mubr.msk.f32.mxu0 %vm4700_vm1, %v4701_v18  ;;  %v2143_v19 = vld [vmem:[#allocation11 + $0x18] sm:$0xff] }
 0x615   : > { %3979 = vmatprep.subr.mxu0 %v4701_v18 }
 0x617   : > { %3972 = vmatmul.mubr.msk.f32.vlgmr.msra.gmra.mrb[10].mxu0 %vm1144_vm4, %v1620_v23 }
 0x618   : > { %3981 = vmatprep.mubr.msk.f32.mxu0 %vm4700_vm1, %v4701_v18  ;;  %3980 = vmatpush3.msra.mxu0 %v927_v40 }
 0x619   : > { %3989 = vmatprep.subr.mxu0 %v4701_v18 }
 0x6b0   : > { %v1615_v24 = vpop.f32.mrb[6].mxu1 }
 0x6b1   : > { %v3968_v25 = vpop.f32.mrb[7].mxu1 }
 0x6b2   : > { %v872_v25 = vld [vmem:[%s761_s14] sm:$0xff] }
 0x6e6   : > { %v1542_v26 = vpop.f32.mrb[8].mxu0 }
 0x6e7   : > { %v1616_v27 = vadd.f32 %v1615_v24, %v1542_v26  ;;  %v3963_v28 = vpop.f32.mrb[9].mxu0  ;;  %v4144_v24 = vpack.c.bf16 %v2139_v22, %v2138_v21  ;;  %v2149_v21 = vld [vmem:[#allocation14 + $0x8] sm:$0xff] }
 0x6ea   : > { %v1693_v29 = vpop.f32.mrb[10].mxu0 }
 0x6eb   : > { %v1697_v30 = vsel %vm1143_vm5, -1e+09, %v1693_v29  ;;  %v3973_v31 = vpop.f32.mrb[11].mxu0 }
 0x6ec   : > { %v1698_v32 = vsel %vm1144_vm4, %v1697_v30, -inf }
 0x6ed   : > { %1699 = vmax.xlane.f32.xlu1 %v1698_v32 }
 0x77a   : > { %v1700_v33 = vpop.xlane.xlu1 %1699 }
 0x77b   : > { %v1701_v34 = vsub.f32 %v1697_v30, %v1700_v33 }
 0x77d   : > { %v1702_v35 = vmul.f32 1.442695, %v1701_v34  ;;  %v3783_v34 = vld [vmem:[%s5588_s18] ss:$0 sm:$0xff] }
 0x77f   : > { %4314 = vpow2.f32 %v1702_v35 }
 0x789   : > { %v4315_v37 = vpop.eup %4314 }
 0x78a   : > { %3977 = vmatmul.mubr.msk.f32.vlgmr.msra.gmra.mrb[8].mxu1 %vm1144_vm4, %v4315_v37  ;;  %v1704_v38 = vsel %vm1144_vm4, %v4315_v37, 0.0  ;;  %v3784_v37 = vld [vmem:[%s5684_s8] ss:$0 sm:$0xff]  ;;  %s5689_s8 = sld [smem:[#allocation41_spill]] }
 0x78b   : > { %3985 = vmatpush3.xpose.msk.msra.mxu1 %vm1144_vm4, %v1862_v36  ;;  %1705 = vadd.xlane.f32.xlu0 %v1704_v38 }
 0x78c   : > { %3986 = vmatprep.mubr.msk.f32.mxu1 %vm4700_vm1, %v4701_v18  ;;  %3994 = vmatprep.subr.mxu1 %v4701_v18 }
 0x78e   : > { %3987 = vmatmul.mubr.msk.f32.vlgmr.msra.gmra.mrb[10].mxu1 %vm1144_vm4, %v1860_v39 }
 0x78f   : > { %3996 = vmatprep.mubr.msk.f32.mxu1 %vm4700_vm1, %v4701_v18  ;;  %3995 = vmatpush3.msra.mxu1 %v928_v57  ;;  %v874_v57 = vld [vmem:[%s870_s5] sm:$0x1]  ;;  %s5687_s5 = sld [smem:[#allocation45_spill]] }
 0x790   : > { %4146 = vmatprep.subr.bf16.mxu1 %v4699_v10  ;;  %vm2369_vm8 = vcmp.eq.f32.partialorder %v874_v57, 0.0 }
 0x818   : > { %v1706_v41 = vpop.xlane.xlu0 %1705 }
 0x819   : > { %4316 = vrcp.f32 %v1706_v41 }
 0x823   : > { %v4317_v42 = vpop.eup %4316 }
 0x85d   : > { %v1780_v43 = vpop.f32.mrb[8].mxu1 }
 0x85e   : > { %v1784_v44 = vmul.f32 %v4317_v42, %v1780_v43  ;;  %v3978_v45 = vpop.f32.mrb[9].mxu1  ;;  %v2144_v42 = vld [vmem:[#allocation13] sm:$0xff]  ;;  %v2145_v43 = vld [vmem:[#allocation13 + $0x8] sm:$0xff] }
 0x85f   : > { %v4153_v45 = vpack.c.bf16 %v2145_v43, %v2144_v42 }
 0x860   : > { %3982 = vmatmul.mubr.msk.f32.vlgmr.msra.gmra.mrb[12].mxu0 %vm1144_vm4, %v1784_v44  ;;  %v2146_v44 = vld [vmem:[#allocation13 + $0x10] sm:$0xff] }
 0x861   : > { %v1933_v47 = vpop.f32.mrb[10].mxu1  ;;  %3991 = vmatprep.mubr.msk.f32.mxu0 %vm4700_vm1, %v4701_v18 }
 0x862   : > { %v1937_v48 = vsel %vm1143_vm5, -1e+09, %v1933_v47  ;;  %v3988_v49 = vpop.f32.mrb[11].mxu1  ;;  %v2147_v47 = vld [vmem:[#allocation13 + $0x18] sm:$0xff] }
 0x863   : > { %v1938_v51 = vsel %vm1144_vm4, %v1937_v48, -inf }
 0x864   : > { %1939 = vmax.xlane.f32.xlu1 %v1938_v51 }
 0x875   : > { %1948 = vrot.lane.b32.xlu1 %v5261_v46, %s4704_s26 }
 0x8f1   : > { %v1940_v52 = vpop.xlane.xlu1 %1939 }
 0x8f2   : > { %v1941_v53 = vsub.f32 %v1937_v48, %v1940_v52  ;;  %v4156_v48 = vpack.c.bf16 %v2147_v47, %v2146_v44 }
 0x8f4   : > { %v1942_v54 = vmul.f32 1.442695, %v1941_v53 }
 0x8f5   : > { %v1949_v55 = vpop.permute.xlu1 %1948 }
 0x8f6   : > { %4318 = vpow2.f32 %v1942_v54  ;;  %3990 = vmatpush3.msra.mxu0 %v1949_v55 }
 0x8f7   : > { %4140 = vmatprep.subr.bf16.mxu0 %v4699_v10 }
 0x900   : > { %v4319_v56 = vpop.eup %4318 }
 0x901   : > { %3992 = vmatmul.mubr.msk.f32.vlgmr.msra.gmra.mrb[14].mxu0 %vm1144_vm4, %v4319_v56  ;;  %v1944_v50 = vsel %vm1144_vm4, %v4319_v56, 0.0 }
 0x902   : > { %1945 = vadd.xlane.f32.xlu1 %v1944_v50  ;;  %4007 = vmatprep.mubr.msk.f32.mxu0 %vm4700_vm1, %v4701_v18  ;;  %v2447_v50 = vlaneseq }
 0x903   : > { %4142 = vmatpush3.bf16.msra.mxu0 %v4141_v20 }
 0x904   : > { %4143 = vmatprep.subr.bf16.mxu0 %v4699_v10 }
 0x907   : > { %4145 = vmatpush3.bf16.msra.mxu0 %v4144_v24 }
 0x908   : > { %4152 = vmatprep.subr.bf16.mxu0 %v4699_v10 }
 0x933   : > { %v1854_v46 = vpop.f32.mrb[12].mxu0 }
 0x934   : > { %v1858_v58 = vadd.f32 %v1854_v46, %v1616_v27  ;;  %v3983_v59 = vpop.f32.mrb[13].mxu0  ;;  %v2448_v46 = vshrl.u32 %v2447_v50, 7 }
 0x935   : > { %v4705_v59 = vmov 0  }
 0x98f   : > { %v1946_v60 = vpop.xlane.xlu1 %1945 }
 0x990   : > { %4320 = vrcp.f32 %v1946_v60  ;;  %v2446_v60 = vsel %vm2369_vm8, 1, %v4705_v59 }
 0x99a   : > { %v4321_v61 = vpop.eup %4320 }
 0x9d4   : > { %v2020_v62 = vpop.f32.mrb[14].mxu0 }
 0x9d5   : > { %v2024_v63 = vmul.f32 %v4321_v61, %v2020_v62  ;;  %v3993_v1 = vpop.f32.mrb[15].mxu0 }
 0x9d7   : > { %3997 = vmatmul.mubr.msk.f32.vlgmr.msra.gmra.mrb[12].mxu1 %vm1144_vm4, %v2024_v63 }
 0x9d8   : > { %4018 = vmatprep.mubr.msk.f32.mxu1 %vm4700_vm1, %v4701_v18  ;;  %4148 = vmatpush3.bf16.msra.mxu1 %v4147_v16 }
 0x9d9   : > { %4149 = vmatprep.subr.bf16.mxu1 %v4699_v10 }
 0xaaa   : > { %v2094_v2 = vpop.f32.mrb[12].mxu1 }
 0xaab   : > { %v2098_v3 = vadd.f32 %v2094_v2, %v1858_v58  ;;  %v3998_v4 = vpop.f32.mrb[13].mxu1  ;;  %v2449_v58 = vsub.s32 0, %v2448_v46 }
 0xaad   : > { %v5345_v5 = vadd.f32 %v2098_v3, %v5181_v0  ;;  %v2142_v0 = vld [vmem:[#allocation11 + $0x10] sm:$0xff]  ;;  %v5399_v61 = vrot.slane %v2446_v60, %v2449_v58 }
 0xaae   : > { %v4150_v23 = vpack.c.bf16 %v2143_v19, %v2142_v0  ;;  %v2148_v0 = vld [vmem:[#allocation14] sm:$0xff] }
 0xaaf   : > { %v2102_v6 = vsel %vm877_vm0, %v5345_v5, 0.0  ;;  %vm2451_vm9 = vcmp.eq.s32.totalorder %v5399_v61, 1  ;;  %v2151_v61 = vld [vmem:[#allocation14 + $0x18] sm:$0xff] }
 0xab0   : > { %2103 = vadd.xlane.f32.xlu0 %v2102_v6  ;;  %4151 = vmatpush3.bf16.msra.mxu1 %v4150_v23 }
 0xab1   : > { %4032 = vmatprep.subr.mxu1 %v4701_v18 }
 0xab3   : > { %4019 = vmatmul.mubr.msk.f32.vlgmr.msra.gmra.mrb[14].mxu1 %vm877_vm0, %v872_v25 }
 0xab4   : > { %4034 = vmatprep.mubr.msk.f32.mxu1 %vm4700_vm1, %v4701_v18 }
 0xb3d   : > { %v2104_v7 = vpop.xlane.xlu0 %2103 }
 0xb3e   : > { %v2105_v8 = vmul.f32 0.03125, %v2104_v7 }
 0xb40   : > { %v2106_v9 = vsub.f32 %v5345_v5, %v2105_v8 }
 0xb42   : > { %v2107_v11 = vmul.f32 %v2106_v9, %v2106_v9  ;;  %v2127_v35 = vmul.f32 %v3783_v34, %v2106_v9 }
 0xb44   : > { %v2108_v12 = vsel %vm877_vm0, %v2107_v11, 0.0 }
 0xb45   : > { %2109 = vadd.xlane.f32.xlu0 %v2108_v12 }
 0xb86   : > { %v5369_v40 = vpop.f32.mrb[14].mxu1 }
 0xb87   : > { %v4020_v41 = vpop.f32.mrb[15].mxu1  ;;  %2539 = vrot.lane.b32.xlu0 %v5369_v40, %s4702_s1  ;;  %4033 = vmatpush3.xpose.msk.msra.mxu1 %vm1144_vm4, %v5369_v40 }
 0xb88   : > { %4037 = vmatprep.subr.mxu1 %v4701_v18 }
 0xbd2   : > { %v2110_v26 = vpop.xlane.xlu0 %2109 }
 0xbd3   : > { %v2111_v27 = vmul.f32 0.032258064, %v2110_v26 }
 0xbd5   : > { %4322 = vrsqrt.f32 %v2111_v27  ;;  %vm2114_vm6 = vcmp.eq.f32.partialorder %v2111_v27, inf  ;;  %v2117_v30 = vand.u32 2147483648, %v2111_v27  ;;  %vm2116_vm7 = vcmp.eq.f32.partialorder %v2111_v27, 0.0 }
 0xbdf   : > { %v4323_v28 = vpop.eup %4322 }
 0xbe0   : > { %v2113_v29 = vmul.f32 %v4323_v28, %v2111_v27 }
 0xbe2   : > { %v2115_v31 = vsel %vm2114_vm6, %v2111_v27, %v2113_v29 }
 0xbe3   : > { %v2118_v32 = vsel %vm2116_vm7, %v2117_v30, %v2115_v31 }
 0xbe4   : > { %v2119_v33 = vadd.f32 1e-06, %v2118_v32 }
 0xbe6   : > { %4324 = vrcp.f32 %v2119_v33 }
 0xbf0   : > { %v4325_v36 = vpop.eup %4324 }
 0xbf1   : > { %v2128_v38 = vmul.f32 %v4325_v36, %v2127_v35 }
 0xbf3   : > { %v2135_v39 = vadd.f32 %v3784_v37, %v2128_v38 }
 0xbf5   : > { %4008 = vmatmul.mubr.msk.f32.vlgmr.msra.gmra.mrb[16].mxu0 %vm877_vm0, %v2135_v39 }
 0xbf6   : > { %4029 = vmatprep.mubr.msk.f32.mxu0 %vm4700_vm1, %v4701_v18  ;;  %4154 = vmatpush3.bf16.msra.mxu0 %v4153_v45 }
 0xbf7   : > { %4155 = vmatprep.subr.bf16.mxu0 %v4699_v10 }
 0xbf9   : > { %v2540_v49 = vpop.permute.xlu0 %2539 }
 0xbfa   : > { %4157 = vmatpush3.bf16.msra.mxu0 %v4156_v48 }
 0xbfb   : > { %4042 = vmatprep.subr.mxu0 %v4701_v18 }
 0xbfd   : > { %4030 = vmatmul.mubr.msk.f32.vlgmr.msra.gmra.mrb[18].mxu0 %vm877_vm0, %v872_v25 }
 0xbfe   : > { %4044 = vmatprep.mubr.msk.f32.mxu0 %vm4700_vm1, %v4701_v18 }
 0xc03   : > { %4043 = vmatpush3.xpose.msk.msra.mxu0 %vm1144_vm4, %v2540_v49 }
 0xc04   : > { %4052 = vmatprep.subr.mxu0 %v4701_v18 }
 0xcc8   : > { %v2221_v51 = vpop.f32.mrb[16].mxu0 }
 0xcc9   : > { %v2225_v52 = vmul.f32 0.35355338, %v2221_v51  ;;  %v4009_v53 = vpop.f32.mrb[17].mxu0 }
 0xccb   : > { %2537 = vrot.lane.b32.xlu1 %v2225_v52, %s4702_s1  ;;  %4035 = vmatmul.mubr.msk.f32.vlgmr.msra.gmra.mrb[16].mxu1 %vm1144_vm4, %v2225_v52 }
 0xccc   : > { %4039 = vmatprep.mubr.msk.f32.mxu1 %vm4700_vm1, %v4701_v18 }
 0xcd0   : > { %v5387_v54 = vpop.f32.mrb[18].mxu0 }
 0xcd1   : > { %v4031_v55 = vpop.f32.mrb[19].mxu0  ;;  %4038 = vmatpush3.msra.mxu1 %v5387_v54 }
 0xcd2   : > { %4047 = vmatprep.subr.mxu1 %v4701_v18 }
 0xd3d   : > { %v2538_v56 = vpop.permute.xlu1 %2537 }
 0xd3e   : > { %4045 = vmatmul.mubr.msk.f32.vlgmr.msra.gmra.mrb[20].mxu0 %vm1144_vm4, %v2538_v56 }
 0xd3f   : > { %4054 = vmatprep.mubr.msk.f32.mxu0 %vm4700_vm1, %v4701_v18  ;;  %4053 = vmatpush3.msra.mxu0 %v2149_v21 }
 0xd40   : > { %4062 = vmatprep.subr.mxu0 %v4701_v18 }
 0xd9e   : > { %v2442_v62 = vpop.f32.mrb[16].mxu1 }
 0xd9f   : > { %v2452_v63 = vsel %vm2451_vm9, -1e+09, %v2442_v62  ;;  %v4036_v1 = vpop.f32.mrb[17].mxu1 }
 0xda0   : > { %v2453_v2 = vsel %vm1144_vm4, %v2452_v63, -inf }
 0xda1   : > { %2454 = vmax.xlane.f32.xlu0 %v2453_v2 }
 0xdb7   : > { %2627 = vrot.lane.b32.xlu0 %v5387_v54, %s4702_s1  ;;  %s5688_s1 = sld [smem:[#allocation46_spill]] }
 0xdbb   : > { %2852 = vrot.lane.b32.xlu0 %v5369_v40, %s4703_s13 }
 0xe11   : > { %v2611_v3 = vpop.f32.mrb[20].mxu0 }
 0xe12   : > { %v2615_v4 = vsel %vm2451_vm9, -1e+09, %v2611_v3  ;;  %v4046_v6 = vpop.f32.mrb[21].mxu0 }
 0xe13   : > { %v2616_v7 = vsel %vm1144_vm4, %v2615_v4, -inf }
 0xe14   : > { %2617 = vmax.xlane.f32.xlu1 %v2616_v7 }
 0xe2e   : > { %v2455_v8 = vpop.xlane.xlu0 %2454 }
 0xe2f   : > { %v2456_v9 = vsub.f32 %v2452_v63, %v2455_v8 }
 0xe31   : > { %v2457_v11 = vmul.f32 1.442695, %v2456_v9 }
 0xe32   : > { %v2628_v13 = vpop.permute.xlu0 %2627 }
 0xe33   : > { %4326 = vpow2.f32 %v2457_v11 }
 0xe36   : > { %v2853_v22 = vpop.permute.xlu0 %2852 }
 0xe3d   : > { %v4327_v12 = vpop.eup %4326 }
 0xe3e   : > { %4040 = vmatmul.mubr.msk.f32.vlgmr.msra.gmra.mrb[18].mxu1 %vm1144_vm4, %v4327_v12  ;;  %v2459_v14 = vsel %vm1144_vm4, %v4327_v12, 0.0 }
 0xe3f   : > { %2460 = vadd.xlane.f32.xlu0 %v2459_v14  ;;  %4048 = vmatpush3.msra.mxu1 %v2628_v13 }
 0xe40   : > { %4049 = vmatprep.mubr.msk.f32.mxu1 %vm4700_vm1, %v4701_v18  ;;  %4057 = vmatprep.subr.mxu1 %v4701_v18 }
 0xe55   : > { %2939 = vrot.lane.b32.xlu0 %v5387_v54, %s4703_s13 }
 0xe59   : > { %3090 = vrot.lane.b32.xlu0 %v2225_v52, %s4704_s26 }
 0xea1   : > { %v2618_v15 = vpop.xlane.xlu1 %2617 }
 0xea2   : > { %v2619_v16 = vsub.f32 %v2615_v4, %v2618_v15 }
 0xea4   : > { %v2620_v17 = vmul.f32 1.442695, %v2619_v16 }
 0xea6   : > { %4328 = vpow2.f32 %v2620_v17 }
 0xeb0   : > { %v4329_v19 = vpop.eup %4328 }
 0xeb1   : > { %4050 = vmatmul.mubr.msk.f32.vlgmr.msra.gmra.mrb[20].mxu1 %vm1144_vm4, %v4329_v19  ;;  %v2622_v20 = vsel %vm1144_vm4, %v4329_v19, 0.0 }
 0xeb2   : > { %2623 = vadd.xlane.f32.xlu1 %v2622_v20  ;;  %4058 = vmatpush3.msra.mxu1 %v2148_v0 }
 0xeb3   : > { %4059 = vmatprep.mubr.msk.f32.mxu1 %vm4700_vm1, %v4701_v18  ;;  %4067 = vmatprep.subr.mxu1 %v4701_v18 }
 0xec3   : > { %2850 = vrot.lane.b32.xlu1 %v2225_v52, %s4703_s13 }
 0xecc   : > { %v2461_v23 = vpop.xlane.xlu0 %2460 }
 0xecd   : > { %4330 = vrcp.f32 %v2461_v23 }
 0xed0   : > { %v2940_v28 = vpop.permute.xlu0 %2939 }
 0xed4   : > { %v3091_v53 = vpop.permute.xlu0 %3090 }
 0xed7   : > { %v4331_v24 = vpop.eup %4330 }
 0xf11   : > { %v2532_v25 = vpop.f32.mrb[18].mxu1 }
 0xf12   : > { %v2536_v26 = vmul.f32 %v4331_v24, %v2532_v25  ;;  %v4041_v27 = vpop.f32.mrb[19].mxu1  ;;  %v3367_v25 = vld [vmem:[#allocation16] sm:$0xff] }
 0xf14   : > { %4060 = vmatmul.mubr.msk.f32.vlgmr.msra.gmra.mrb[22].mxu1 %vm1144_vm4, %v2536_v26  ;;  %v3369_v26 = vld [vmem:[#allocation16 + $0x10] sm:$0xff] }
 0xf15   : > { %4068 = vmatpush3.msra.mxu1 %v2940_v28  ;;  %4069 = vmatprep.mubr.msk.f32.mxu1 %vm4700_vm1, %v4701_v18  ;;  %v3370_v28 = vld [vmem:[#allocation16 + $0x18] sm:$0xff] }
 0xf16   : > { %4077 = vmatprep.subr.mxu1 %v4701_v18 }
 0xf3f   : > { %v2624_v29 = vpop.xlane.xlu1 %2623 }
 0xf40   : > { %4332 = vrcp.f32 %v2624_v29  ;;  %v3372_v29 = vld [vmem:[%s5686_s9] sm:$0xff] }
 0xf43   : > { %v2851_v34 = vpop.permute.xlu1 %2850 }
 0xf4a   : > { %v4333_v30 = vpop.eup %4332 }
 0xf84   : > { %v2699_v31 = vpop.f32.mrb[20].mxu1 }
 0xf85   : > { %v2703_v32 = vmul.f32 %v4333_v30, %v2699_v31  ;;  %v4051_v33 = vpop.f32.mrb[21].mxu1  ;;  %v3373_v30 = vld [vmem:[%s5686_s9 + $0x8] sm:$0xff]  ;;  %v3374_v31 = vld [vmem:[%s5686_s9 + $0x10] sm:$0xff] }
 0xf86   : > { %v3375_v33 = vld [vmem:[%s5686_s9 + $0x18] sm:$0xff] }
 0xf87   : > { %4055 = vmatmul.mubr.msk.f32.vlgmr.msra.gmra.mrb[22].mxu0 %vm1144_vm4, %v2703_v32  ;;  %v4165_v32 = vpack.c.bf16 %v3373_v30, %v3372_v29 }
 0xf88   : > { %4063 = vmatpush3.xpose.msk.msra.mxu0 %vm1144_vm4, %v2853_v22  ;;  %4064 = vmatprep.mubr.msk.f32.mxu0 %vm4700_vm1, %v4701_v18 }
 0xf89   : > { %4072 = vmatprep.subr.mxu0 %v4701_v18 }
 0xf8b   : > { %4065 = vmatmul.mubr.msk.f32.vlgmr.msra.gmra.mrb[24].mxu0 %vm1144_vm4, %v2851_v34  ;;  %v4168_v34 = vpack.c.bf16 %v3375_v33, %v3374_v31 }
 0xf8c   : > { %4074 = vmatprep.mubr.msk.f32.mxu0 %vm4700_vm1, %v4701_v18 }
 0xfe7   : > { %v2846_v35 = vpop.f32.mrb[22].mxu1 }
 0xfe8   : > { %v4061_v36 = vpop.f32.mrb[23].mxu1 }
 0xfe9   : > { %v3377_v36 = vld [vmem:[%s5686_s9 + $0x28] sm:$0xff] }
0x105a   : > { %v2773_v37 = vpop.f32.mrb[22].mxu0 }
0x105b   : > { %v2847_v38 = vadd.f32 %v2846_v35, %v2773_v37  ;;  %v4056_v39 = vpop.f32.mrb[23].mxu0  ;;  %v3376_v35 = vld [vmem:[%s5686_s9 + $0x20] sm:$0xff] }
0x105c   : > { %v4171_v37 = vpack.c.bf16 %v3377_v36, %v3376_v35 }
0x105e   : > { %v2924_v41 = vpop.f32.mrb[24].mxu0 }
0x105f   : > { %v2928_v42 = vsel %vm2451_vm9, -1e+09, %v2924_v41  ;;  %v4066_v43 = vpop.f32.mrb[25].mxu0 }
0x1060   : > { %v2929_v44 = vsel %vm1144_vm4, %v2928_v42, -inf }
0x1061   : > { %2930 = vmax.xlane.f32.xlu1 %v2929_v44 }
0x1072   : > { %3092 = vrot.lane.b32.xlu1 %v5369_v40, %s4704_s26  ;;  %v2150_v40 = vld [vmem:[#allocation14 + $0x10] sm:$0xff] }
0x1073   : > { %4073 = vmatpush3.msra.mxu0 %v2150_v40  ;;  %v3378_v40 = vld [vmem:[%s5686_s9 + $0x30] sm:$0xff] }
0x1074   : > { %4082 = vmatprep.subr.mxu0 %v4701_v18 }
0x10ee   : > { %v2931_v45 = vpop.xlane.xlu1 %2930 }
0x10ef   : > { %v2932_v47 = vsub.f32 %v2928_v42, %v2931_v45 }
0x10f1   : > { %v2933_v48 = vmul.f32 1.442695, %v2932_v47 }
0x10f2   : > { %v3093_v51 = vpop.permute.xlu1 %3092 }
0x10f3   : > { %4334 = vpow2.f32 %v2933_v48  ;;  %v3804_v48 = vld [vmem:[%s5687_s5] ss:$0 sm:$0xff]  ;;  %s3811_s5 = sshll.u32 %s4843_s23, 7  ;;  %s4604_s23 = scalar_lea.vmem %s5527_s21, 128 }
0x10f4   : > { %p4605_p1 = scmp.ne.s32.totalorder %s5527_s21, %s4604_s23  ;;  %p4612_p10 = scmp.lt.s32.totalorder %s4610_s22, %s4604_s23 }
0x10f6   : > { %p4606_p4 = pnand %p4605_p1, %p5693_p0  ;;  %p4613_p2 = por %p4612_p10, %p4611_p12 }
0x10f8   : > { %p4607_p7 = pneg %p4606_p4 }
0x10fa   : > { %p4614_p8 = pnand %p4613_p2, %p4607_p7 }
0x10fd   : > { %v4335_v49 = vpop.eup %4334 }
0x10fe   : > { %4070 = vmatmul.mubr.msk.f32.vlgmr.msra.gmra.mrb[24].mxu1 %vm1144_vm4, %v4335_v49  ;;  %v2935_v52 = vsel %vm1144_vm4, %v4335_v49, 0.0 }
0x10ff   : > { %4078 = vmatpush3.xpose.msk.msra.mxu1 %vm1144_vm4, %v3093_v51  ;;  %2936 = vadd.xlane.f32.xlu0 %v2935_v52 }
0x1100   : > { %4079 = vmatprep.mubr.msk.f32.mxu1 %vm4700_vm1, %v4701_v18  ;;  %4087 = vmatprep.subr.mxu1 %v4701_v18 }
0x1102   : > { %4080 = vmatmul.mubr.msk.f32.vlgmr.msra.gmra.mrb[26].mxu1 %vm1144_vm4, %v3091_v53 }
0x1103   : > { %4089 = vmatprep.mubr.msk.f32.mxu1 %vm4700_vm1, %v4701_v18  ;;  %4088 = vmatpush3.msra.mxu1 %v2151_v61 }
0x1104   : > { %4164 = vmatprep.subr.bf16.mxu1 %v4699_v10 }
0x1115   : > { %3179 = vrot.lane.b32.xlu0 %v5387_v54, %s4704_s26  ;;  %s5692_s26 = sld [smem:[#allocation47_spill]] }
0x111b   : > { %s5525_s14 = scalar_lea.hbm %s5692_s26, %s3811_s5 }
0x118c   : > { %v2937_v55 = vpop.xlane.xlu0 %2936 }
0x118d   : > { %4336 = vrcp.f32 %v2937_v55  ;;  %v3379_v55 = vld [vmem:[%s5686_s9 + $0x38] sm:$0xff] }
0x1190   : > { %v3180_v58 = vpop.permute.xlu0 %3179 }
0x1197   : > { %v4337_v56 = vpop.eup %4336 }
0x11d1   : > { %v3011_v50 = vpop.f32.mrb[24].mxu1 }
0x11d2   : > { %v3015_v57 = vmul.f32 %v4337_v56, %v3011_v50  ;;  %v4071_v46 = vpop.f32.mrb[25].mxu1  ;;  %v4174_v56 = vpack.c.bf16 %v3379_v55, %v3378_v40  ;;  %v3806_v50 = vld [vmem:[%s5689_s8] ss:$0 sm:$0xff] }
0x11d4   : > { %4075 = vmatmul.mubr.msk.f32.vlgmr.msra.gmra.mrb[26].mxu0 %vm1144_vm4, %v3015_v57 }
0x11d5   : > { %4083 = vmatpush3.msra.mxu0 %v3180_v58  ;;  %v3164_v59 = vpop.f32.mrb[26].mxu1  ;;  %4084 = vmatprep.mubr.msk.f32.mxu0 %vm4700_vm1, %v4701_v18 }
0x11d6   : > { %v3168_v54 = vsel %vm2451_vm9, -1e+09, %v3164_v59  ;;  %v4081_v60 = vpop.f32.mrb[27].mxu1  ;;  %4158 = vmatprep.subr.bf16.mxu0 %v4699_v10 }
0x11d7   : > { %v3169_v62 = vsel %vm1144_vm4, %v3168_v54, -inf }
0x11d8   : > { %3170 = vmax.xlane.f32.xlu1 %v3169_v62 }
0x1265   : > { %v3171_v63 = vpop.xlane.xlu1 %3170 }
0x1266   : > { %v3172_v1 = vsub.f32 %v3168_v54, %v3171_v63  ;;  %v3808_v54 = vld [vmem:[%s5691_s20] ss:$0 sm:$0xff] }
0x1268   : > { %v3173_v2 = vmul.f32 1.442695, %v3172_v1 }
0x126a   : > { %4338 = vpow2.f32 %v3173_v2 }
0x1274   : > { %v4339_v3 = vpop.eup %4338 }
0x1275   : > { %4085 = vmatmul.mubr.msk.f32.vlgmr.msra.gmra.mrb[28].mxu0 %vm1144_vm4, %v4339_v3  ;;  %v3175_v4 = vsel %vm1144_vm4, %v4339_v3, 0.0 }
0x1276   : > { %3176 = vadd.xlane.f32.xlu1 %v3175_v4  ;;  %4100 = vmatprep.mubr.msk.f32.mxu0 %vm4700_vm1, %v4701_v18 }
0x12a7   : > { %v3085_v6 = vpop.f32.mrb[26].mxu0 }
0x12a8   : > { %v3089_v7 = vadd.f32 %v3085_v6, %v2847_v38  ;;  %v4076_v8 = vpop.f32.mrb[27].mxu0 }
0x1303   : > { %v3177_v9 = vpop.xlane.xlu1 %3176 }
0x1304   : > { %4340 = vrcp.f32 %v3177_v9 }
0x130e   : > { %v4341_v11 = vpop.eup %4340 }
0x1348   : > { %v3251_v12 = vpop.f32.mrb[28].mxu0 }
0x1349   : > { %v3255_v13 = vmul.f32 %v4341_v11, %v3251_v12  ;;  %v4086_v14 = vpop.f32.mrb[29].mxu0 }
0x134b   : > { %4090 = vmatmul.mubr.msk.f32.vlgmr.msra.gmra.mrb[28].mxu1 %vm1144_vm4, %v3255_v13 }
0x134c   : > { %4119 = vmatprep.mubr.msk.f32.mxu1 %vm4700_vm1, %v4701_v18  ;;  %v3368_v18 = vld [vmem:[#allocation16 + $0x8] sm:$0xff]  ;;  %4166 = vmatpush3.bf16.msra.mxu1 %v4165_v32 }
0x134d   : > { %v4159_v27 = vpack.c.bf16 %v3368_v18, %v3367_v25  ;;  %4167 = vmatprep.subr.bf16.mxu1 %v4699_v10 }
0x134f   : > { %4160 = vmatpush3.bf16.msra.mxu0 %v4159_v27 }
0x1350   : > { %4161 = vmatprep.subr.bf16.mxu0 %v4699_v10  ;;  %4169 = vmatpush3.bf16.msra.mxu1 %v4168_v34 }
0x1351   : > { %4170 = vmatprep.subr.bf16.mxu1 %v4699_v10 }
0x1354   : > { %4172 = vmatpush3.bf16.msra.mxu1 %v4171_v37 }
0x1355   : > { %4173 = vmatprep.subr.bf16.mxu1 %v4699_v10  ;;  %v3805_v10 = vld [vmem:[%s5688_s1] ss:$0 sm:$0xff] }
0x1358   : > { %4175 = vmatpush3.bf16.msra.mxu1 %v4174_v56 }
0x141e   : > { %v3325_v15 = vpop.f32.mrb[28].mxu1 }
0x141f   : > { %v3329_v16 = vadd.f32 %v3325_v15, %v3089_v7  ;;  %v4091_v17 = vpop.f32.mrb[29].mxu1 }
0x1421   : > { %v5472_v0 = vadd.f32 %v3329_v16, %v5345_v5  ;;  %v4162_v5 = vpack.c.bf16 %v3370_v28, %v3369_v26 }
0x1423   : > { %v3333_v19 = vsel %vm877_vm0, %v5472_v0, 0.0  ;;  %4163 = vmatpush3.bf16.msra.mxu0 %v4162_v5 }
0x1424   : > { %3334 = vadd.xlane.f32.xlu1 %v3333_v19 }
0x14b1   : > { %v3335_v20 = vpop.xlane.xlu1 %3334 }
0x14b2   : > { %v3336_v21 = vmul.f32 0.03125, %v3335_v20 }
0x14b4   : > { %v3337_v22 = vsub.f32 %v5472_v0, %v3336_v21 }
0x14b6   : > { %v3338_v23 = vmul.f32 %v3337_v22, %v3337_v22  ;;  %v3358_v49 = vmul.f32 %v3804_v48, %v3337_v22 }
0x14b8   : > { %v3339_v24 = vsel %vm877_vm0, %v3338_v23, 0.0 }
0x14b9   : > { %3340 = vadd.xlane.f32.xlu0 %v3339_v24 }
0x1546   : > { %v3341_v38 = vpop.xlane.xlu0 %3340 }
0x1547   : > { %v3342_v39 = vmul.f32 0.032258064, %v3341_v38 }
0x1549   : > { %4342 = vrsqrt.f32 %v3342_v39  ;;  %vm3345_vm10 = vcmp.eq.f32.partialorder %v3342_v39, inf  ;;  %v3348_v43 = vand.u32 2147483648, %v3342_v39  ;;  %vm3347_vm11 = vcmp.eq.f32.partialorder %v3342_v39, 0.0 }
0x1553   : > { %v4343_v41 = vpop.eup %4342 }
0x1554   : > { %v3344_v42 = vmul.f32 %v4343_v41, %v3342_v39 }
0x1556   : > { %v3346_v44 = vsel %vm3345_vm10, %v3342_v39, %v3344_v42 }
0x1557   : > { %v3349_v45 = vsel %vm3347_vm11, %v3348_v43, %v3346_v44 }
0x1558   : > { %v3350_v47 = vadd.f32 1e-06, %v3349_v45 }
0x155a   : > { %4344 = vrcp.f32 %v3350_v47 }
0x1564   : > { %v4345_v51 = vpop.eup %4344 }
0x1565   : > { %v3359_v52 = vmul.f32 %v4345_v51, %v3358_v49 }
0x1567   : > { %v3366_v53 = vadd.f32 %v3805_v10, %v3359_v52 }
0x1569   : > { %4101 = vmatmul.mubr.msk.f32.vlgmr.msra.gmra.mrb[30].mxu0 %vm877_vm0, %v3366_v53 }
0x163c   : > { %v3456_v57 = vpop.f32.mrb[30].mxu0 }
0x163d   : > { %v3457_v46 = vadd.f32 %v3806_v50, %v3456_v57  ;;  %v4102_v58 = vpop.f32.mrb[31].mxu0 }
0x163f   : > { %v3460_v59 = vmax.f32 %v3457_v46, 0.0 }
0x1641   : > { %4120 = vmatmul.mubr.msk.f32.vlgmr.msra.gmra.mrb[30].mxu1 %vm3467_vm12, %v3460_v59 }
0x1714   : > { %v3537_v60 = vpop.f32.mrb[30].mxu1 }
0x1715   : > { %v3538_v62 = vadd.f32 %v3808_v54, %v3537_v60  ;;  %v4121_v63 = vpop.f32.mrb[31].mxu1 }
0x1717   : > { %v3541_v1 = vadd.f32 %v3538_v62, %v5472_v0 }
0x1719   : > { %3542 = vst.msk [vmem:[%s867_s6] sm:$0xff] %vm877_vm0, %v3541_v1 }
0x171a   : > { %4617 = shalt.err (!%p4614_p8)
}
0x171b   : > { %s4618_s27 = scalar_lea.hbm %s5525_s14, 128  ;;  %s4622_s0 = scalar_lea.hbm %s5692_s26, 256 }
0x171c   : > { %p4619_p13 = scmp.ne.s32.totalorder %s5525_s14, %s4618_s27  ;;  %p4623_p11 = scmp.lt.u32.totalorder %s5525_s14, %s5692_s26 }
0x171d   : > { %p4624_p3 = scmp.lt.u32.totalorder %s4622_s0, %s4618_s27  ;;  %p4626_p1 = scmp.lt.u32.totalorder %s4618_s27, %s5525_s14 }
0x171e   : > { %p4620_p5 = pnand %p4619_p13, %p5693_p0 }
0x171f   : > { %p4625_p6 = por %p4624_p3, %p4623_p11 }
0x1720   : > { %p4621_p9 = pneg %p4620_p5 }
0x1721   : > { %p4627_p4 = por %p4626_p1, %p4625_p6 }
0x1723   : > { %p4628_p7 = pnand %p4627_p4, %p4621_p9 }
0x1725   : > { %4631 = shalt.err (!%p4628_p7)
}
0x1726   : > { %4206 = dma.vmem_to_hbm [thread:$0]  (%p5693_p0), %s5527_s21, 128, %s5525_s14, %s3544_s15  }
0x1727 PF: > { %s5694_s6 = sld [smem:[#allocation24_spill]]  ;;  %s5695_s1 = sld [smem:[#allocation29_spill]] }
0x1728   : > { %s5696_s13 = sld [smem:[#allocation25_spill]] }
0x172d   : > { %s3569_s23 = sand.u32 1, %s5694_s6   ;;  %p5697_p12 = scmp.ne.s32.totalorder %s5695_s1, 0 }
0x172e   : > { %p5698_p10 = scmp.ge.s32.totalorder %s5696_s13, 2  ;;  %s3570_s4 = scalar_lea.sflag [#allocation4], %s3569_s23 }
0x1730   : > { %p4238_p2 = pnand %p5698_p10, %p5697_p12 }
0x1732   : > { %4669 = dma.done.wait (!%p4238_p2), %s3570_s4, 128  }
0x1733   : > { %4671 = vsyncadd (!%p4238_p2), %s3570_s4, 4294967168  ;;  %s5699_s30 = sld [smem:[#allocation26_spill]]  ;;  %s5700_s22 = sld [smem:[#allocation27_spill]] }
0x1734   : > { %s5701_s3 = smov %s4678_s28  ;;  %s5702_s28 = smov %s4682_s29 }
0x1739   : > { %p41_p8 = scmp.ge.s32.totalorder %s5699_s30, 4   ;;  %s5703_s29 = smov %s5700_s22 }
0x173b   :  { %43 = sbr.rel (!%p41_p8) target bundleno = 29 (0x1d), region = 204 }
0x1742   :  { %3575 = vsyncpa [#allocation3], 1 }
0x1743   :  { %3577 = vsyncpa [#allocation3 + $0x1], 1 }
0x1744   :  { %3578 = vsyncpa [#allocation6], 1 }
0x1745   :  { %3580 = vsyncpa [#allocation6 + $0x1], 1 }
0x1746   :  { %3581 = vsyncpa [#allocation9], 1 }
0x1747   :  { %3582 = vsyncpa [#allocation12], 1 }
0x1748   :  { %3583 = vsyncpa [#allocation15], 1 }
0x1749   :  { %3584 = vsyncpa [#allocation4], 1 }
0x174a   :  { %3586 = vsyncpa [#allocation4 + $0x1], 1 }

</bundles_post_ra>
